<compile_context>
chip_gen: v7x
topology: tpu7x:2x2x1
jax: 0.10.0
libtpu: 0.0.40
codegen_flags: <defaults>
</compile_context>

<pallas_src>
import functools

import jax
import jax.numpy as jnp
from jax.experimental import pallas as pl
from jax.experimental.pallas import tpu as pltpu  # noqa: F401  (no scratch needed at this size)


# ---------------------------------------------------------------------------
# Fused Pallas kernel: L LSTM layers + linear head, single invocation,
# wavefront schedule across layers.
# ---------------------------------------------------------------------------
def _fused_lstm_kernel(*refs, T, B, H, L):
    # refs = (x, [wih_l, whh_l, bias_l] * L, w_out, b_out, out)
    x_ref = refs[0]
    layer_refs = refs[1:1 + 3 * L]
    wout_ref = refs[1 + 3 * L]
    bout_ref = refs[2 + 3 * L]
    out_ref = refs[3 + 3 * L]

    # Hoisted (VMEM -> vreg) loads of all resident weights/biases.
    wih = [layer_refs[3 * l][...] for l in range(L)]        # (in_l, 4H) bf16
    whh = [layer_refs[3 * l + 1][...] for l in range(L)]    # (H, 4H)   bf16
    bias = [layer_refs[3 * l + 2][...] for l in range(L)]   # (1, 4H)   f32 (b_ih+b_hh)
    wout = wout_ref[...]                                    # (H, O)    bf16
    bout = bout_ref[...]                                    # (1, O)    f32

    # Layer-0 input projection for ALL timesteps: one batched MXU matmul,
    # entirely off the recurrence chain.
    x = x_ref[...]                                          # (T*B, in) f32
    gates_in0 = (jnp.dot(x.astype(jnp.bfloat16), wih[0],
                         preferred_element_type=jnp.float32)
                 + bias[0])                                 # (T*B, 4H) f32

    # Per-layer recurrent state, carried in vregs (no VMEM traffic).
    h_bf16 = [jnp.zeros((B, H), jnp.bfloat16) for _ in range(L)]
    c_f32 = [jnp.zeros((B, H), jnp.float32) for _ in range(L)]
    # Layer-l output at each timestep (bf16, vreg-resident), consumed by
    # layer l+1 exactly one wavefront step later.
    h_seq = [[None] * T for _ in range(L)]

    def lstm_cell(g, c_prev):
        # Full-width sigmoid: one EUP push over the whole (B, 4H) gate vreg.
        sig = jax.nn.sigmoid(g)
        i_g = sig[:, 0 * H:1 * H]
        f_g = sig[:, 1 * H:2 * H]
        o_g = sig[:, 3 * H:4 * H]
        g_g = jnp.tanh(g[:, 2 * H:3 * H])
        # TODO(synk): the 32-lane gate extracts could be reduced further with
        # a prep-time gate-column permutation + pltpu.roll; minor at this size.
        c_new = f_g * c_prev + i_g * g_g                    # f32 cell state
        h_new = o_g * jnp.tanh(c_new)
        return h_new, c_new

    # Wavefront: s = t + l.  (l, t) depends only on (l-1, t) and (l, t-1),
    # both produced at wavefront step s-1, so all cells within one s are
    # independent straight-line code -> cross-layer ILP.
    for s in range(T + L - 1):
        for l in range(L):
            t = s - l
            if t < 0 or t >= T:
                continue

            if l == 0:
                g = (gates_in0[t * B:(t + 1) * B, :]
                     + jnp.dot(h_bf16[0], whh[0],
                               preferred_element_type=jnp.float32))
            else:
                # Per-step input projection from the layer below (enables the
                # wavefront); the two dots are independent and overlap.
                g = (jnp.dot(h_seq[l - 1][t], wih[l],
                             preferred_element_type=jnp.float32)
                     + jnp.dot(h_bf16[l], whh[l],
                               preferred_element_type=jnp.float32)
                     + bias[l])

            h_new, c_new = lstm_cell(g, c_f32[l])
            c_f32[l] = c_new
            hb = h_new.astype(jnp.bfloat16)                 # cast once per step
            h_bf16[l] = hb
            h_seq[l][t] = hb

            if l == L - 1:
                # Linear head folded into the wavefront; this store is never
                # reloaded, so it is off the recurrence critical path.
                out_ref[pl.ds(t * B, B), :] = (
                    jnp.dot(hb, wout, preferred_element_type=jnp.float32)
                    + bout)


# ---------------------------------------------------------------------------
# Wrappers
# ---------------------------------------------------------------------------
def _fused_lstm_call(x_flat, layer_params, wout_t, bout, *, T, B, H, L):
    """x_flat: (T*B, I) time-major-flattened f32.  Returns (T*B, O) f32."""
    O = wout_t.shape[1]

    inputs = [x_flat]
    in_specs = [pl.BlockSpec(x_flat.shape, lambda: (0, 0))]
    for (wih_t, whh_t, bias) in layer_params:
        for a in (wih_t, whh_t, bias):
            inputs.append(a)
            in_specs.append(pl.BlockSpec(a.shape, lambda: (0, 0)))
    inputs += [wout_t, bout]
    in_specs += [pl.BlockSpec(wout_t.shape, lambda: (0, 0)),
                 pl.BlockSpec(bout.shape, lambda: (0, 0))]

    kernel = functools.partial(_fused_lstm_kernel, T=T, B=B, H=H, L=L)

    return pl.pallas_call(
        kernel,
        out_shape=jax.ShapeDtypeStruct((T * B, O), jnp.float32),
        in_specs=in_specs,
        out_specs=pl.BlockSpec((T * B, O), lambda: (0, 0)),
    )(*inputs)


def init_params(key, input_size, hidden_size, output_size, layers):
    """PyTorch-style init: U(-1/sqrt(H), 1/sqrt(H))."""
    params = {"lstm": [], "out": None}
    k = 1.0 / jnp.sqrt(hidden_size)
    for l in range(layers):
        in_sz = input_size if l == 0 else hidden_size
        key, k1, k2, k3, k4 = jax.random.split(key, 5)
        w_ih = jax.random.uniform(k1, (4 * hidden_size, in_sz), jnp.float32, -k, k)
        w_hh = jax.random.uniform(k2, (4 * hidden_size, hidden_size), jnp.float32, -k, k)
        b_ih = jax.random.uniform(k3, (4 * hidden_size,), jnp.float32, -k, k)
        b_hh = jax.random.uniform(k4, (4 * hidden_size,), jnp.float32, -k, k)
        params["lstm"].append((w_ih, w_hh, b_ih, b_hh))
    key, k1, k2 = jax.random.split(key, 3)
    w_out = jax.random.uniform(k1, (output_size, hidden_size), jnp.float32, -k, k)
    b_out = jax.random.uniform(k2, (output_size,), jnp.float32, -k, k)
    params["out"] = (w_out, b_out)
    return params


def prepare_params(params):
    """One-time prep: transposes, bias sums, bf16 weight casts (MXU operands)."""
    layers = []
    for (w_ih, w_hh, b_ih, b_hh) in params["lstm"]:
        layers.append((
            jnp.transpose(w_ih).astype(jnp.bfloat16),            # (in, 4H)
            jnp.transpose(w_hh).astype(jnp.bfloat16),            # (H, 4H)
            (b_ih + b_hh).reshape(1, -1).astype(jnp.float32),    # (1, 4H)
        ))
    w_out, b_out = params["out"]
    return {
        "lstm": layers,
        "out": (jnp.transpose(w_out).astype(jnp.bfloat16),       # (H, O)
                b_out.reshape(1, -1).astype(jnp.float32)),       # (1, O)
    }


def lstm_forward(prepped, x):
    """x: (B, T, INPUT_SIZE) batch-first.  Returns (B, T, OUTPUT_SIZE)."""
    B, T, I = x.shape
    H = prepped["lstm"][0][1].shape[0]          # whh_t is (H, 4H)
    L = len(prepped["lstm"])
    wout_t, bout = prepped["out"]

    # Single boundary transpose to time-major, then everything fused in-kernel.
    x_flat = jnp.transpose(x, (1, 0, 2)).reshape(T * B, I).astype(jnp.float32)
    out2d = _fused_lstm_call(x_flat, prepped["lstm"], wout_t, bout,
                             T=T, B=B, H=H, L=L)                  # (T*B, O)
    O = out2d.shape[1]
    return jnp.transpose(out2d.reshape(T, B, O), (1, 0, 2))       # (B, T, O)


# ---------------------------------------------------------------------------
# Pure-JAX f32 reference (PyTorch nn.LSTM eval-mode semantics) for validation.
# ---------------------------------------------------------------------------
def _lstm_reference(params, x):
    B, T, _ = x.shape
    seq = x
    for (w_ih, w_hh, b_ih, b_hh) in params["lstm"]:
        Hh = w_hh.shape[1]
        h = jnp.zeros((B, Hh), jnp.float32)
        c = jnp.zeros((B, Hh), jnp.float32)
        outs = []
        for t in range(T):
            g = seq[:, t, :] @ w_ih.T + h @ w_hh.T + b_ih + b_hh
            i_g, f_g, g_g, o_g = jnp.split(g, 4, axis=1)
            i_g = jax.nn.sigmoid(i_g)
            f_g = jax.nn.sigmoid(f_g)
            o_g = jax.nn.sigmoid(o_g)
            g_g = jnp.tanh(g_g)
            c = f_g * c + i_g * g_g
            h = o_g * jnp.tanh(c)
            outs.append(h)
        seq = jnp.stack(outs, axis=1)
    w_out, b_out = params["out"]
    return seq @ w_out.T + b_out


if __name__ == "__main__":
    INPUT_SIZE = 16
    HIDDEN_SIZE = 32
    OUTPUT_SIZE = 8
    LAYERS = 2
    DROP_RATE = 0.1   # training-time only; unused at inference

    B, T = 2, 8

    key = jax.random.PRNGKey(0)
    key, xkey = jax.random.split(key)
    x = jax.random.normal(xkey, (B, T, INPUT_SIZE), jnp.float32)

    params = init_params(key, INPUT_SIZE, HIDDEN_SIZE, OUTPUT_SIZE, LAYERS)
    prepped = prepare_params(params)

    fwd = jax.jit(lstm_forward)
    out = jax.block_until_ready(fwd(prepped, x))

    assert out.shape == (B, T, OUTPUT_SIZE), out.shape
    assert bool(jnp.all(jnp.isfinite(out)))

    # Tolerance check vs. f32 reference (bf16 MXU operands, f32 accumulation).
    ref = _lstm_reference(params, x)
    assert bool(jnp.allclose(out, ref, atol=5e-2, rtol=5e-2)), \
        float(jnp.max(jnp.abs(out - ref)))

    print("KERNEL_OK")
</pallas_src>

<mosaic_0001>
module attributes {stable_mosaic.version = 11 : i64} {
  func.func @_fused_lstm_kernel(%arg0: memref<16x16xf32, #tpu.memory_space<vmem>>, %arg1: memref<16x128xbf16, #tpu.memory_space<vmem>>, %arg2: memref<32x128xbf16, #tpu.memory_space<vmem>>, %arg3: memref<1x128xf32, #tpu.memory_space<vmem>>, %arg4: memref<32x128xbf16, #tpu.memory_space<vmem>>, %arg5: memref<32x128xbf16, #tpu.memory_space<vmem>>, %arg6: memref<1x128xf32, #tpu.memory_space<vmem>>, %arg7: memref<32x8xbf16, #tpu.memory_space<vmem>>, %arg8: memref<1x8xf32, #tpu.memory_space<vmem>>, %arg9: memref<16x8xf32, #tpu.memory_space<vmem>>) attributes {dimension_semantics = [], scalar_prefetch = 0 : i64, scratch_operands = 0 : i64, tpu.core_type = #tpu.core_type<tc>} {
    %c0 = arith.constant 0 : index
    %c0_0 = arith.constant 0 : index
    %0 = vector.load %arg1[%c0, %c0_0] : memref<16x128xbf16, #tpu.memory_space<vmem>>, vector<16x128xbf16>
    %c0_1 = arith.constant 0 : index
    %c0_2 = arith.constant 0 : index
    %1 = vector.load %arg4[%c0_1, %c0_2] : memref<32x128xbf16, #tpu.memory_space<vmem>>, vector<32x128xbf16>
    %c0_3 = arith.constant 0 : index
    %c0_4 = arith.constant 0 : index
    %2 = vector.load %arg2[%c0_3, %c0_4] : memref<32x128xbf16, #tpu.memory_space<vmem>>, vector<32x128xbf16>
    %c0_5 = arith.constant 0 : index
    %c0_6 = arith.constant 0 : index
    %3 = vector.load %arg5[%c0_5, %c0_6] : memref<32x128xbf16, #tpu.memory_space<vmem>>, vector<32x128xbf16>
    %c0_7 = arith.constant 0 : index
    %c0_8 = arith.constant 0 : index
    %4 = vector.load %arg3[%c0_7, %c0_8] : memref<1x128xf32, #tpu.memory_space<vmem>>, vector<1x128xf32>
    %c0_9 = arith.constant 0 : index
    %c0_10 = arith.constant 0 : index
    %5 = vector.load %arg6[%c0_9, %c0_10] : memref<1x128xf32, #tpu.memory_space<vmem>>, vector<1x128xf32>
    %c0_11 = arith.constant 0 : index
    %c0_12 = arith.constant 0 : index
    %6 = vector.load %arg7[%c0_11, %c0_12] : memref<32x8xbf16, #tpu.memory_space<vmem>>, vector<32x8xbf16>
    %c0_13 = arith.constant 0 : index
    %c0_14 = arith.constant 0 : index
    %7 = vector.load %arg8[%c0_13, %c0_14] : memref<1x8xf32, #tpu.memory_space<vmem>>, vector<1x8xf32>
    %c0_15 = arith.constant 0 : index
    %c0_16 = arith.constant 0 : index
    %8 = vector.load %arg0[%c0_15, %c0_16] : memref<16x16xf32, #tpu.memory_space<vmem>>, vector<16x16xf32>
    %9 = arith.truncf %8 : vector<16x16xf32> to vector<16x16xbf16>
    %cst = arith.constant dense<0.000000e+00> : vector<16x128xf32>
    %10 = tpu.matmul %9, %0, %cst {dimension_numbers = #tpu.dot_dimension_numbers<[1], [0], [0], [1], [0, 0, 1, 1], [], []>} : vector<16x16xbf16>, vector<16x128xbf16>, vector<16x128xf32> -> vector<16x128xf32>
    %11 = vector.broadcast %4 : vector<1x128xf32> to vector<16x128xf32>
    %12 = arith.addf %10, %11 : vector<16x128xf32>
    %cst_17 = arith.constant 0.000000e+00 : bf16
    %13 = vector.broadcast %cst_17 : bf16 to vector<2x32xbf16>
    %cst_18 = arith.constant 0.000000e+00 : bf16
    %14 = vector.broadcast %cst_18 : bf16 to vector<2x32xbf16>
    %cst_19 = arith.constant 0.000000e+00 : f32
    %15 = vector.broadcast %cst_19 : f32 to vector<2x32xf32>
    %cst_20 = arith.constant 0.000000e+00 : f32
    %16 = vector.broadcast %cst_20 : f32 to vector<2x32xf32>
    %17 = vector.extract_strided_slice %12 {offsets = [0, 0], sizes = [2, 128], strides = [1, 1]} : vector<16x128xf32> to vector<2x128xf32>
    %cst_21 = arith.constant dense<0.000000e+00> : vector<2x128xf32>
    %18 = tpu.matmul %13, %2, %cst_21 {dimension_numbers = #tpu.dot_dimension_numbers<[1], [0], [0], [1], [0, 0, 1, 1], [], []>} : vector<2x32xbf16>, vector<32x128xbf16>, vector<2x128xf32> -> vector<2x128xf32>
    %19 = arith.addf %17, %18 : vector<2x128xf32>
    %20 = arith.negf %19 : vector<2x128xf32>
    %21 = math.exp %20 : vector<2x128xf32>
    %cst_22 = arith.constant 1.000000e+00 : f32
    %22 = vector.broadcast %cst_22 : f32 to vector<2x128xf32>
    %23 = arith.addf %22, %21 : vector<2x128xf32>
    %24 = arith.divf %22, %23 : vector<2x128xf32>
    %25 = vector.extract_strided_slice %24 {offsets = [0, 0], sizes = [2, 32], strides = [1, 1]} : vector<2x128xf32> to vector<2x32xf32>
    %26 = vector.extract_strided_slice %24 {offsets = [0, 32], sizes = [2, 32], strides = [1, 1]} : vector<2x128xf32> to vector<2x32xf32>
    %27 = vector.extract_strided_slice %24 {offsets = [0, 96], sizes = [2, 32], strides = [1, 1]} : vector<2x128xf32> to vector<2x32xf32>
    %28 = vector.extract_strided_slice %19 {offsets = [0, 64], sizes = [2, 32], strides = [1, 1]} : vector<2x128xf32> to vector<2x32xf32>
    %29 = math.tanh %28 : vector<2x32xf32>
    %30 = arith.mulf %26, %15 : vector<2x32xf32>
    %31 = arith.mulf %25, %29 : vector<2x32xf32>
    %32 = arith.addf %30, %31 : vector<2x32xf32>
    %33 = math.tanh %32 : vector<2x32xf32>
    %34 = arith.mulf %27, %33 : vector<2x32xf32>
    %35 = arith.truncf %34 : vector<2x32xf32> to vector<2x32xbf16>
    %36 = vector.extract_strided_slice %12 {offsets = [2, 0], sizes = [2, 128], strides = [1, 1]} : vector<16x128xf32> to vector<2x128xf32>
    %cst_23 = arith.constant dense<0.000000e+00> : vector<2x128xf32>
    %37 = tpu.matmul %35, %2, %cst_23 {dimension_numbers = #tpu.dot_dimension_numbers<[1], [0], [0], [1], [0, 0, 1, 1], [], []>} : vector<2x32xbf16>, vector<32x128xbf16>, vector<2x128xf32> -> vector<2x128xf32>
    %38 = arith.addf %36, %37 : vector<2x128xf32>
    %39 = arith.negf %38 : vector<2x128xf32>
    %40 = math.exp %39 : vector<2x128xf32>
    %cst_24 = arith.constant 1.000000e+00 : f32
    %41 = vector.broadcast %cst_24 : f32 to vector<2x128xf32>
    %42 = arith.addf %41, %40 : vector<2x128xf32>
    %43 = arith.divf %41, %42 : vector<2x128xf32>
    %44 = vector.extract_strided_slice %43 {offsets = [0, 0], sizes = [2, 32], strides = [1, 1]} : vector<2x128xf32> to vector<2x32xf32>
    %45 = vector.extract_strided_slice %43 {offsets = [0, 32], sizes = [2, 32], strides = [1, 1]} : vector<2x128xf32> to vector<2x32xf32>
    %46 = vector.extract_strided_slice %43 {offsets = [0, 96], sizes = [2, 32], strides = [1, 1]} : vector<2x128xf32> to vector<2x32xf32>
    %47 = vector.extract_strided_slice %38 {offsets = [0, 64], sizes = [2, 32], strides = [1, 1]} : vector<2x128xf32> to vector<2x32xf32>
    %48 = math.tanh %47 : vector<2x32xf32>
    %49 = arith.mulf %45, %32 : vector<2x32xf32>
    %50 = arith.mulf %44, %48 : vector<2x32xf32>
    %51 = arith.addf %49, %50 : vector<2x32xf32>
    %52 = math.tanh %51 : vector<2x32xf32>
    %53 = arith.mulf %46, %52 : vector<2x32xf32>
    %54 = arith.truncf %53 : vector<2x32xf32> to vector<2x32xbf16>
    %cst_25 = arith.constant dense<0.000000e+00> : vector<2x128xf32>
    %55 = tpu.matmul %35, %1, %cst_25 {dimension_numbers = #tpu.dot_dimension_numbers<[1], [0], [0], [1], [0, 0, 1, 1], [], []>} : vector<2x32xbf16>, vector<32x128xbf16>, vector<2x128xf32> -> vector<2x128xf32>
    %cst_26 = arith.constant dense<0.000000e+00> : vector<2x128xf32>
    %56 = tpu.matmul %14, %3, %cst_26 {dimension_numbers = #tpu.dot_dimension_numbers<[1], [0], [0], [1], [0, 0, 1, 1], [], []>} : vector<2x32xbf16>, vector<32x128xbf16>, vector<2x128xf32> -> vector<2x128xf32>
    %57 = arith.addf %55, %56 : vector<2x128xf32>
    %58 = vector.broadcast %5 : vector<1x128xf32> to vector<2x128xf32>
    %59 = arith.addf %57, %58 : vector<2x128xf32>
    %60 = arith.negf %59 : vector<2x128xf32>
    %61 = math.exp %60 : vector<2x128xf32>
    %cst_27 = arith.constant 1.000000e+00 : f32
    %62 = vector.broadcast %cst_27 : f32 to vector<2x128xf32>
    %63 = arith.addf %62, %61 : vector<2x128xf32>
    %64 = arith.divf %62, %63 : vector<2x128xf32>
    %65 = vector.extract_strided_slice %64 {offsets = [0, 0], sizes = [2, 32], strides = [1, 1]} : vector<2x128xf32> to vector<2x32xf32>
    %66 = vector.extract_strided_slice %64 {offsets = [0, 32], sizes = [2, 32], strides = [1, 1]} : vector<2x128xf32> to vector<2x32xf32>
    %67 = vector.extract_strided_slice %64 {offsets = [0, 96], sizes = [2, 32], strides = [1, 1]} : vector<2x128xf32> to vector<2x32xf32>
    %68 = vector.extract_strided_slice %59 {offsets = [0, 64], sizes = [2, 32], strides = [1, 1]} : vector<2x128xf32> to vector<2x32xf32>
    %69 = math.tanh %68 : vector<2x32xf32>
    %70 = arith.mulf %66, %16 : vector<2x32xf32>
    %71 = arith.mulf %65, %69 : vector<2x32xf32>
    %72 = arith.addf %70, %71 : vector<2x32xf32>
    %73 = math.tanh %72 : vector<2x32xf32>
    %74 = arith.mulf %67, %73 : vector<2x32xf32>
    %75 = arith.truncf %74 : vector<2x32xf32> to vector<2x32xbf16>
    %cst_28 = arith.constant dense<0.000000e+00> : vector<2x8xf32>
    %76 = tpu.matmul %75, %6, %cst_28 {dimension_numbers = #tpu.dot_dimension_numbers<[1], [0], [0], [1], [0, 0, 1, 1], [], []>} : vector<2x32xbf16>, vector<32x8xbf16>, vector<2x8xf32> -> vector<2x8xf32>
    %77 = vector.broadcast %7 : vector<1x8xf32> to vector<2x8xf32>
    %78 = arith.addf %76, %77 : vector<2x8xf32>
    %c0_29 = arith.constant 0 : index
    %c0_30 = arith.constant 0 : index
    %79 = vector.load %arg9[%c0_29, %c0_30] : memref<16x8xf32, #tpu.memory_space<vmem>>, vector<2x8xf32>
    tpu.vector_store %arg9[%c0_29, %c0_30], %78 {strides = array<i32>} : memref<16x8xf32, #tpu.memory_space<vmem>>, vector<2x8xf32>,
    %80 = vector.extract_strided_slice %12 {offsets = [4, 0], sizes = [2, 128], strides = [1, 1]} : vector<16x128xf32> to vector<2x128xf32>
    %cst_31 = arith.constant dense<0.000000e+00> : vector<2x128xf32>
    %81 = tpu.matmul %54, %2, %cst_31 {dimension_numbers = #tpu.dot_dimension_numbers<[1], [0], [0], [1], [0, 0, 1, 1], [], []>} : vector<2x32xbf16>, vector<32x128xbf16>, vector<2x128xf32> -> vector<2x128xf32>
    %82 = arith.addf %80, %81 : vector<2x128xf32>
    %83 = arith.negf %82 : vector<2x128xf32>
    %84 = math.exp %83 : vector<2x128xf32>
    %cst_32 = arith.constant 1.000000e+00 : f32
    %85 = vector.broadcast %cst_32 : f32 to vector<2x128xf32>
    %86 = arith.addf %85, %84 : vector<2x128xf32>
    %87 = arith.divf %85, %86 : vector<2x128xf32>
    %88 = vector.extract_strided_slice %87 {offsets = [0, 0], sizes = [2, 32], strides = [1, 1]} : vector<2x128xf32> to vector<2x32xf32>
    %89 = vector.extract_strided_slice %87 {offsets = [0, 32], sizes = [2, 32], strides = [1, 1]} : vector<2x128xf32> to vector<2x32xf32>
    %90 = vector.extract_strided_slice %87 {offsets = [0, 96], sizes = [2, 32], strides = [1, 1]} : vector<2x128xf32> to vector<2x32xf32>
    %91 = vector.extract_strided_slice %82 {offsets = [0, 64], sizes = [2, 32], strides = [1, 1]} : vector<2x128xf32> to vector<2x32xf32>
    %92 = math.tanh %91 : vector<2x32xf32>
    %93 = arith.mulf %89, %51 : vector<2x32xf32>
    %94 = arith.mulf %88, %92 : vector<2x32xf32>
    %95 = arith.addf %93, %94 : vector<2x32xf32>
    %96 = math.tanh %95 : vector<2x32xf32>
    %97 = arith.mulf %90, %96 : vector<2x32xf32>
    %98 = arith.truncf %97 : vector<2x32xf32> to vector<2x32xbf16>
    %cst_33 = arith.constant dense<0.000000e+00> : vector<2x128xf32>
    %99 = tpu.matmul %54, %1, %cst_33 {dimension_numbers = #tpu.dot_dimension_numbers<[1], [0], [0], [1], [0, 0, 1, 1], [], []>} : vector<2x32xbf16>, vector<32x128xbf16>, vector<2x128xf32> -> vector<2x128xf32>
    %cst_34 = arith.constant dense<0.000000e+00> : vector<2x128xf32>
    %100 = tpu.matmul %75, %3, %cst_34 {dimension_numbers = #tpu.dot_dimension_numbers<[1], [0], [0], [1], [0, 0, 1, 1], [], []>} : vector<2x32xbf16>, vector<32x128xbf16>, vector<2x128xf32> -> vector<2x128xf32>
    %101 = arith.addf %99, %100 : vector<2x128xf32>
    %102 = vector.broadcast %5 : vector<1x128xf32> to vector<2x128xf32>
    %103 = arith.addf %101, %102 : vector<2x128xf32>
    %104 = arith.negf %103 : vector<2x128xf32>
    %105 = math.exp %104 : vector<2x128xf32>
    %cst_35 = arith.constant 1.000000e+00 : f32
    %106 = vector.broadcast %cst_35 : f32 to vector<2x128xf32>
    %107 = arith.addf %106, %105 : vector<2x128xf32>
    %108 = arith.divf %106, %107 : vector<2x128xf32>
    %109 = vector.extract_strided_slice %108 {offsets = [0, 0], sizes = [2, 32], strides = [1, 1]} : vector<2x128xf32> to vector<2x32xf32>
    %110 = vector.extract_strided_slice %108 {offsets = [0, 32], sizes = [2, 32], strides = [1, 1]} : vector<2x128xf32> to vector<2x32xf32>
    %111 = vector.extract_strided_slice %108 {offsets = [0, 96], sizes = [2, 32], strides = [1, 1]} : vector<2x128xf32> to vector<2x32xf32>
    %112 = vector.extract_strided_slice %103 {offsets = [0, 64], sizes = [2, 32], strides = [1, 1]} : vector<2x128xf32> to vector<2x32xf32>
    %113 = math.tanh %112 : vector<2x32xf32>
    %114 = arith.mulf %110, %72 : vector<2x32xf32>
    %115 = arith.mulf %109, %113 : vector<2x32xf32>
    %116 = arith.addf %114, %115 : vector<2x32xf32>
    %117 = math.tanh %116 : vector<2x32xf32>
    %118 = arith.mulf %111, %117 : vector<2x32xf32>
    %119 = arith.truncf %118 : vector<2x32xf32> to vector<2x32xbf16>
    %cst_36 = arith.constant dense<0.000000e+00> : vector<2x8xf32>
    %120 = tpu.matmul %119, %6, %cst_36 {dimension_numbers = #tpu.dot_dimension_numbers<[1], [0], [0], [1], [0, 0, 1, 1], [], []>} : vector<2x32xbf16>, vector<32x8xbf16>, vector<2x8xf32> -> vector<2x8xf32>
    %121 = vector.broadcast %7 : vector<1x8xf32> to vector<2x8xf32>
    %122 = arith.addf %120, %121 : vector<2x8xf32>
    %c2 = arith.constant 2 : index
    %c0_37 = arith.constant 0 : index
    %123 = vector.load %arg9[%c2, %c0_37] : memref<16x8xf32, #tpu.memory_space<vmem>>, vector<2x8xf32>
    tpu.vector_store %arg9[%c2, %c0_37], %122 {strides = array<i32>} : memref<16x8xf32, #tpu.memory_space<vmem>>, vector<2x8xf32>,
    %124 = vector.extract_strided_slice %12 {offsets = [6, 0], sizes = [2, 128], strides = [1, 1]} : vector<16x128xf32> to vector<2x128xf32>
    %cst_38 = arith.constant dense<0.000000e+00> : vector<2x128xf32>
    %125 = tpu.matmul %98, %2, %cst_38 {dimension_numbers = #tpu.dot_dimension_numbers<[1], [0], [0], [1], [0, 0, 1, 1], [], []>} : vector<2x32xbf16>, vector<32x128xbf16>, vector<2x128xf32> -> vector<2x128xf32>
    %126 = arith.addf %124, %125 : vector<2x128xf32>
    %127 = arith.negf %126 : vector<2x128xf32>
    %128 = math.exp %127 : vector<2x128xf32>
    %cst_39 = arith.constant 1.000000e+00 : f32
    %129 = vector.broadcast %cst_39 : f32 to vector<2x128xf32>
    %130 = arith.addf %129, %128 : vector<2x128xf32>
    %131 = arith.divf %129, %130 : vector<2x128xf32>
    %132 = vector.extract_strided_slice %131 {offsets = [0, 0], sizes = [2, 32], strides = [1, 1]} : vector<2x128xf32> to vector<2x32xf32>
    %133 = vector.extract_strided_slice %131 {offsets = [0, 32], sizes = [2, 32], strides = [1, 1]} : vector<2x128xf32> to vector<2x32xf32>
    %134 = vector.extract_strided_slice %131 {offsets = [0, 96], sizes = [2, 32], strides = [1, 1]} : vector<2x128xf32> to vector<2x32xf32>
    %135 = vector.extract_strided_slice %126 {offsets = [0, 64], sizes = [2, 32], strides = [1, 1]} : vector<2x128xf32> to vector<2x32xf32>
    %136 = math.tanh %135 : vector<2x32xf32>
    %137 = arith.mulf %133, %95 : vector<2x32xf32>
    %138 = arith.mulf %132, %136 : vector<2x32xf32>
    %139 = arith.addf %137, %138 : vector<2x32xf32>
    %140 = math.tanh %139 : vector<2x32xf32>
    %141 = arith.mulf %134, %140 : vector<2x32xf32>
    %142 = arith.truncf %141 : vector<2x32xf32> to vector<2x32xbf16>
    %cst_40 = arith.constant dense<0.000000e+00> : vector<2x128xf32>
    %143 = tpu.matmul %98, %1, %cst_40 {dimension_numbers = #tpu.dot_dimension_numbers<[1], [0], [0], [1], [0, 0, 1, 1], [], []>} : vector<2x32xbf16>, vector<32x128xbf16>, vector<2x128xf32> -> vector<2x128xf32>
    %cst_41 = arith.constant dense<0.000000e+00> : vector<2x128xf32>
    %144 = tpu.matmul %119, %3, %cst_41 {dimension_numbers = #tpu.dot_dimension_numbers<[1], [0], [0], [1], [0, 0, 1, 1], [], []>} : vector<2x32xbf16>, vector<32x128xbf16>, vector<2x128xf32> -> vector<2x128xf32>
    %145 = arith.addf %143, %144 : vector<2x128xf32>
    %146 = vector.broadcast %5 : vector<1x128xf32> to vector<2x128xf32>
    %147 = arith.addf %145, %146 : vector<2x128xf32>
    %148 = arith.negf %147 : vector<2x128xf32>
    %149 = math.exp %148 : vector<2x128xf32>
    %cst_42 = arith.constant 1.000000e+00 : f32
    %150 = vector.broadcast %cst_42 : f32 to vector<2x128xf32>
    %151 = arith.addf %150, %149 : vector<2x128xf32>
    %152 = arith.divf %150, %151 : vector<2x128xf32>
    %153 = vector.extract_strided_slice %152 {offsets = [0, 0], sizes = [2, 32], strides = [1, 1]} : vector<2x128xf32> to vector<2x32xf32>
    %154 = vector.extract_strided_slice %152 {offsets = [0, 32], sizes = [2, 32], strides = [1, 1]} : vector<2x128xf32> to vector<2x32xf32>
    %155 = vector.extract_strided_slice %152 {offsets = [0, 96], sizes = [2, 32], strides = [1, 1]} : vector<2x128xf32> to vector<2x32xf32>
    %156 = vector.extract_strided_slice %147 {offsets = [0, 64], sizes = [2, 32], strides = [1, 1]} : vector<2x128xf32> to vector<2x32xf32>
    %157 = math.tanh %156 : vector<2x32xf32>
    %158 = arith.mulf %154, %116 : vector<2x32xf32>
    %159 = arith.mulf %153, %157 : vector<2x32xf32>
    %160 = arith.addf %158, %159 : vector<2x32xf32>
    %161 = math.tanh %160 : vector<2x32xf32>
    %162 = arith.mulf %155, %161 : vector<2x32xf32>
    %163 = arith.truncf %162 : vector<2x32xf32> to vector<2x32xbf16>
    %cst_43 = arith.constant dense<0.000000e+00> : vector<2x8xf32>
    %164 = tpu.matmul %163, %6, %cst_43 {dimension_numbers = #tpu.dot_dimension_numbers<[1], [0], [0], [1], [0, 0, 1, 1], [], []>} : vector<2x32xbf16>, vector<32x8xbf16>, vector<2x8xf32> -> vector<2x8xf32>
    %165 = vector.broadcast %7 : vector<1x8xf32> to vector<2x8xf32>
    %166 = arith.addf %164, %165 : vector<2x8xf32>
    %c4 = arith.constant 4 : index
    %c0_44 = arith.constant 0 : index
    %167 = vector.load %arg9[%c4, %c0_44] : memref<16x8xf32, #tpu.memory_space<vmem>>, vector<2x8xf32>
    tpu.vector_store %arg9[%c4, %c0_44], %166 {strides = array<i32>} : memref<16x8xf32, #tpu.memory_space<vmem>>, vector<2x8xf32>,
    %168 = vector.extract_strided_slice %12 {offsets = [8, 0], sizes = [2, 128], strides = [1, 1]} : vector<16x128xf32> to vector<2x128xf32>
    %cst_45 = arith.constant dense<0.000000e+00> : vector<2x128xf32>
    %169 = tpu.matmul %142, %2, %cst_45 {dimension_numbers = #tpu.dot_dimension_numbers<[1], [0], [0], [1], [0, 0, 1, 1], [], []>} : vector<2x32xbf16>, vector<32x128xbf16>, vector<2x128xf32> -> vector<2x128xf32>
    %170 = arith.addf %168, %169 : vector<2x128xf32>
    %171 = arith.negf %170 : vector<2x128xf32>
    %172 = math.exp %171 : vector<2x128xf32>
    %cst_46 = arith.constant 1.000000e+00 : f32
    %173 = vector.broadcast %cst_46 : f32 to vector<2x128xf32>
    %174 = arith.addf %173, %172 : vector<2x128xf32>
    %175 = arith.divf %173, %174 : vector<2x128xf32>
    %176 = vector.extract_strided_slice %175 {offsets = [0, 0], sizes = [2, 32], strides = [1, 1]} : vector<2x128xf32> to vector<2x32xf32>
    %177 = vector.extract_strided_slice %175 {offsets = [0, 32], sizes = [2, 32], strides = [1, 1]} : vector<2x128xf32> to vector<2x32xf32>
    %178 = vector.extract_strided_slice %175 {offsets = [0, 96], sizes = [2, 32], strides = [1, 1]} : vector<2x128xf32> to vector<2x32xf32>
    %179 = vector.extract_strided_slice %170 {offsets = [0, 64], sizes = [2, 32], strides = [1, 1]} : vector<2x128xf32> to vector<2x32xf32>
    %180 = math.tanh %179 : vector<2x32xf32>
    %181 = arith.mulf %177, %139 : vector<2x32xf32>
    %182 = arith.mulf %176, %180 : vector<2x32xf32>
    %183 = arith.addf %181, %182 : vector<2x32xf32>
    %184 = math.tanh %183 : vector<2x32xf32>
    %185 = arith.mulf %178, %184 : vector<2x32xf32>
    %186 = arith.truncf %185 : vector<2x32xf32> to vector<2x32xbf16>
    %cst_47 = arith.constant dense<0.000000e+00> : vector<2x128xf32>
    %187 = tpu.matmul %142, %1, %cst_47 {dimension_numbers = #tpu.dot_dimension_numbers<[1], [0], [0], [1], [0, 0, 1, 1], [], []>} : vector<2x32xbf16>, vector<32x128xbf16>, vector<2x128xf32> -> vector<2x128xf32>
    %cst_48 = arith.constant dense<0.000000e+00> : vector<2x128xf32>
    %188 = tpu.matmul %163, %3, %cst_48 {dimension_numbers = #tpu.dot_dimension_numbers<[1], [0], [0], [1], [0, 0, 1, 1], [], []>} : vector<2x32xbf16>, vector<32x128xbf16>, vector<2x128xf32> -> vector<2x128xf32>
    %189 = arith.addf %187, %188 : vector<2x128xf32>
    %190 = vector.broadcast %5 : vector<1x128xf32> to vector<2x128xf32>
    %191 = arith.addf %189, %190 : vector<2x128xf32>
    %192 = arith.negf %191 : vector<2x128xf32>
    %193 = math.exp %192 : vector<2x128xf32>
    %cst_49 = arith.constant 1.000000e+00 : f32
    %194 = vector.broadcast %cst_49 : f32 to vector<2x128xf32>
    %195 = arith.addf %194, %193 : vector<2x128xf32>
    %196 = arith.divf %194, %195 : vector<2x128xf32>
    %197 = vector.extract_strided_slice %196 {offsets = [0, 0], sizes = [2, 32], strides = [1, 1]} : vector<2x128xf32> to vector<2x32xf32>
    %198 = vector.extract_strided_slice %196 {offsets = [0, 32], sizes = [2, 32], strides = [1, 1]} : vector<2x128xf32> to vector<2x32xf32>
    %199 = vector.extract_strided_slice %196 {offsets = [0, 96], sizes = [2, 32], strides = [1, 1]} : vector<2x128xf32> to vector<2x32xf32>
    %200 = vector.extract_strided_slice %191 {offsets = [0, 64], sizes = [2, 32], strides = [1, 1]} : vector<2x128xf32> to vector<2x32xf32>
    %201 = math.tanh %200 : vector<2x32xf32>
    %202 = arith.mulf %198, %160 : vector<2x32xf32>
    %203 = arith.mulf %197, %201 : vector<2x32xf32>
    %204 = arith.addf %202, %203 : vector<2x32xf32>
    %205 = math.tanh %204 : vector<2x32xf32>
    %206 = arith.mulf %199, %205 : vector<2x32xf32>
    %207 = arith.truncf %206 : vector<2x32xf32> to vector<2x32xbf16>
    %cst_50 = arith.constant dense<0.000000e+00> : vector<2x8xf32>
    %208 = tpu.matmul %207, %6, %cst_50 {dimension_numbers = #tpu.dot_dimension_numbers<[1], [0], [0], [1], [0, 0, 1, 1], [], []>} : vector<2x32xbf16>, vector<32x8xbf16>, vector<2x8xf32> -> vector<2x8xf32>
    %209 = vector.broadcast %7 : vector<1x8xf32> to vector<2x8xf32>
    %210 = arith.addf %208, %209 : vector<2x8xf32>
    %c6 = arith.constant 6 : index
    %c0_51 = arith.constant 0 : index
    %211 = vector.load %arg9[%c6, %c0_51] : memref<16x8xf32, #tpu.memory_space<vmem>>, vector<2x8xf32>
    tpu.vector_store %arg9[%c6, %c0_51], %210 {strides = array<i32>} : memref<16x8xf32, #tpu.memory_space<vmem>>, vector<2x8xf32>,
    %212 = vector.extract_strided_slice %12 {offsets = [10, 0], sizes = [2, 128], strides = [1, 1]} : vector<16x128xf32> to vector<2x128xf32>
    %cst_52 = arith.constant dense<0.000000e+00> : vector<2x128xf32>
    %213 = tpu.matmul %186, %2, %cst_52 {dimension_numbers = #tpu.dot_dimension_numbers<[1], [0], [0], [1], [0, 0, 1, 1], [], []>} : vector<2x32xbf16>, vector<32x128xbf16>, vector<2x128xf32> -> vector<2x128xf32>
    %214 = arith.addf %212, %213 : vector<2x128xf32>
    %215 = arith.negf %214 : vector<2x128xf32>
    %216 = math.exp %215 : vector<2x128xf32>
    %cst_53 = arith.constant 1.000000e+00 : f32
    %217 = vector.broadcast %cst_53 : f32 to vector<2x128xf32>
    %218 = arith.addf %217, %216 : vector<2x128xf32>
    %219 = arith.divf %217, %218 : vector<2x128xf32>
    %220 = vector.extract_strided_slice %219 {offsets = [0, 0], sizes = [2, 32], strides = [1, 1]} : vector<2x128xf32> to vector<2x32xf32>
    %221 = vector.extract_strided_slice %219 {offsets = [0, 32], sizes = [2, 32], strides = [1, 1]} : vector<2x128xf32> to vector<2x32xf32>
    %222 = vector.extract_strided_slice %219 {offsets = [0, 96], sizes = [2, 32], strides = [1, 1]} : vector<2x128xf32> to vector<2x32xf32>
    %223 = vector.extract_strided_slice %214 {offsets = [0, 64], sizes = [2, 32], strides = [1, 1]} : vector<2x128xf32> to vector<2x32xf32>
    %224 = math.tanh %223 : vector<2x32xf32>
    %225 = arith.mulf %221, %183 : vector<2x32xf32>
    %226 = arith.mulf %220, %224 : vector<2x32xf32>
    %227 = arith.addf %225, %226 : vector<2x32xf32>
    %228 = math.tanh %227 : vector<2x32xf32>
    %229 = arith.mulf %222, %228 : vector<2x32xf32>
    %230 = arith.truncf %229 : vector<2x32xf32> to vector<2x32xbf16>
    %cst_54 = arith.constant dense<0.000000e+00> : vector<2x128xf32>
    %231 = tpu.matmul %186, %1, %cst_54 {dimension_numbers = #tpu.dot_dimension_numbers<[1], [0], [0], [1], [0, 0, 1, 1], [], []>} : vector<2x32xbf16>, vector<32x128xbf16>, vector<2x128xf32> -> vector<2x128xf32>
    %cst_55 = arith.constant dense<0.000000e+00> : vector<2x128xf32>
    %232 = tpu.matmul %207, %3, %cst_55 {dimension_numbers = #tpu.dot_dimension_numbers<[1], [0], [0], [1], [0, 0, 1, 1], [], []>} : vector<2x32xbf16>, vector<32x128xbf16>, vector<2x128xf32> -> vector<2x128xf32>
    %233 = arith.addf %231, %232 : vector<2x128xf32>
    %234 = vector.broadcast %5 : vector<1x128xf32> to vector<2x128xf32>
    %235 = arith.addf %233, %234 : vector<2x128xf32>
    %236 = arith.negf %235 : vector<2x128xf32>
    %237 = math.exp %236 : vector<2x128xf32>
    %cst_56 = arith.constant 1.000000e+00 : f32
    %238 = vector.broadcast %cst_56 : f32 to vector<2x128xf32>
    %239 = arith.addf %238, %237 : vector<2x128xf32>
    %240 = arith.divf %238, %239 : vector<2x128xf32>
    %241 = vector.extract_strided_slice %240 {offsets = [0, 0], sizes = [2, 32], strides = [1, 1]} : vector<2x128xf32> to vector<2x32xf32>
    %242 = vector.extract_strided_slice %240 {offsets = [0, 32], sizes = [2, 32], strides = [1, 1]} : vector<2x128xf32> to vector<2x32xf32>
    %243 = vector.extract_strided_slice %240 {offsets = [0, 96], sizes = [2, 32], strides = [1, 1]} : vector<2x128xf32> to vector<2x32xf32>
    %244 = vector.extract_strided_slice %235 {offsets = [0, 64], sizes = [2, 32], strides = [1, 1]} : vector<2x128xf32> to vector<2x32xf32>
    %245 = math.tanh %244 : vector<2x32xf32>
    %246 = arith.mulf %242, %204 : vector<2x32xf32>
    %247 = arith.mulf %241, %245 : vector<2x32xf32>
    %248 = arith.addf %246, %247 : vector<2x32xf32>
    %249 = math.tanh %248 : vector<2x32xf32>
    %250 = arith.mulf %243, %249 : vector<2x32xf32>
    %251 = arith.truncf %250 : vector<2x32xf32> to vector<2x32xbf16>
    %cst_57 = arith.constant dense<0.000000e+00> : vector<2x8xf32>
    %252 = tpu.matmul %251, %6, %cst_57 {dimension_numbers = #tpu.dot_dimension_numbers<[1], [0], [0], [1], [0, 0, 1, 1], [], []>} : vector<2x32xbf16>, vector<32x8xbf16>, vector<2x8xf32> -> vector<2x8xf32>
    %253 = vector.broadcast %7 : vector<1x8xf32> to vector<2x8xf32>
    %254 = arith.addf %252, %253 : vector<2x8xf32>
    %c8 = arith.constant 8 : index
    %c0_58 = arith.constant 0 : index
    %255 = vector.load %arg9[%c8, %c0_58] : memref<16x8xf32, #tpu.memory_space<vmem>>, vector<2x8xf32>
    tpu.vector_store %arg9[%c8, %c0_58], %254 {strides = array<i32>} : memref<16x8xf32, #tpu.memory_space<vmem>>, vector<2x8xf32>,
    %256 = vector.extract_strided_slice %12 {offsets = [12, 0], sizes = [2, 128], strides = [1, 1]} : vector<16x128xf32> to vector<2x128xf32>
    %cst_59 = arith.constant dense<0.000000e+00> : vector<2x128xf32>
    %257 = tpu.matmul %230, %2, %cst_59 {dimension_numbers = #tpu.dot_dimension_numbers<[1], [0], [0], [1], [0, 0, 1, 1], [], []>} : vector<2x32xbf16>, vector<32x128xbf16>, vector<2x128xf32> -> vector<2x128xf32>
    %258 = arith.addf %256, %257 : vector<2x128xf32>
    %259 = arith.negf %258 : vector<2x128xf32>
    %260 = math.exp %259 : vector<2x128xf32>
    %cst_60 = arith.constant 1.000000e+00 : f32
    %261 = vector.broadcast %cst_60 : f32 to vector<2x128xf32>
    %262 = arith.addf %261, %260 : vector<2x128xf32>
    %263 = arith.divf %261, %262 : vector<2x128xf32>
    %264 = vector.extract_strided_slice %263 {offsets = [0, 0], sizes = [2, 32], strides = [1, 1]} : vector<2x128xf32> to vector<2x32xf32>
    %265 = vector.extract_strided_slice %263 {offsets = [0, 32], sizes = [2, 32], strides = [1, 1]} : vector<2x128xf32> to vector<2x32xf32>
    %266 = vector.extract_strided_slice %263 {offsets = [0, 96], sizes = [2, 32], strides = [1, 1]} : vector<2x128xf32> to vector<2x32xf32>
    %267 = vector.extract_strided_slice %258 {offsets = [0, 64], sizes = [2, 32], strides = [1, 1]} : vector<2x128xf32> to vector<2x32xf32>
    %268 = math.tanh %267 : vector<2x32xf32>
    %269 = arith.mulf %265, %227 : vector<2x32xf32>
    %270 = arith.mulf %264, %268 : vector<2x32xf32>
    %271 = arith.addf %269, %270 : vector<2x32xf32>
    %272 = math.tanh %271 : vector<2x32xf32>
    %273 = arith.mulf %266, %272 : vector<2x32xf32>
    %274 = arith.truncf %273 : vector<2x32xf32> to vector<2x32xbf16>
    %cst_61 = arith.constant dense<0.000000e+00> : vector<2x128xf32>
    %275 = tpu.matmul %230, %1, %cst_61 {dimension_numbers = #tpu.dot_dimension_numbers<[1], [0], [0], [1], [0, 0, 1, 1], [], []>} : vector<2x32xbf16>, vector<32x128xbf16>, vector<2x128xf32> -> vector<2x128xf32>
    %cst_62 = arith.constant dense<0.000000e+00> : vector<2x128xf32>
    %276 = tpu.matmul %251, %3, %cst_62 {dimension_numbers = #tpu.dot_dimension_numbers<[1], [0], [0], [1], [0, 0, 1, 1], [], []>} : vector<2x32xbf16>, vector<32x128xbf16>, vector<2x128xf32> -> vector<2x128xf32>
    %277 = arith.addf %275, %276 : vector<2x128xf32>
    %278 = vector.broadcast %5 : vector<1x128xf32> to vector<2x128xf32>
    %279 = arith.addf %277, %278 : vector<2x128xf32>
    %280 = arith.negf %279 : vector<2x128xf32>
    %281 = math.exp %280 : vector<2x128xf32>
    %cst_63 = arith.constant 1.000000e+00 : f32
    %282 = vector.broadcast %cst_63 : f32 to vector<2x128xf32>
    %283 = arith.addf %282, %281 : vector<2x128xf32>
    %284 = arith.divf %282, %283 : vector<2x128xf32>
    %285 = vector.extract_strided_slice %284 {offsets = [0, 0], sizes = [2, 32], strides = [1, 1]} : vector<2x128xf32> to vector<2x32xf32>
    %286 = vector.extract_strided_slice %284 {offsets = [0, 32], sizes = [2, 32], strides = [1, 1]} : vector<2x128xf32> to vector<2x32xf32>
    %287 = vector.extract_strided_slice %284 {offsets = [0, 96], sizes = [2, 32], strides = [1, 1]} : vector<2x128xf32> to vector<2x32xf32>
    %288 = vector.extract_strided_slice %279 {offsets = [0, 64], sizes = [2, 32], strides = [1, 1]} : vector<2x128xf32> to vector<2x32xf32>
    %289 = math.tanh %288 : vector<2x32xf32>
    %290 = arith.mulf %286, %248 : vector<2x32xf32>
    %291 = arith.mulf %285, %289 : vector<2x32xf32>
    %292 = arith.addf %290, %291 : vector<2x32xf32>
    %293 = math.tanh %292 : vector<2x32xf32>
    %294 = arith.mulf %287, %293 : vector<2x32xf32>
    %295 = arith.truncf %294 : vector<2x32xf32> to vector<2x32xbf16>
    %cst_64 = arith.constant dense<0.000000e+00> : vector<2x8xf32>
    %296 = tpu.matmul %295, %6, %cst_64 {dimension_numbers = #tpu.dot_dimension_numbers<[1], [0], [0], [1], [0, 0, 1, 1], [], []>} : vector<2x32xbf16>, vector<32x8xbf16>, vector<2x8xf32> -> vector<2x8xf32>
    %297 = vector.broadcast %7 : vector<1x8xf32> to vector<2x8xf32>
    %298 = arith.addf %296, %297 : vector<2x8xf32>
    %c10 = arith.constant 10 : index
    %c0_65 = arith.constant 0 : index
    %299 = vector.load %arg9[%c10, %c0_65] : memref<16x8xf32, #tpu.memory_space<vmem>>, vector<2x8xf32>
    tpu.vector_store %arg9[%c10, %c0_65], %298 {strides = array<i32>} : memref<16x8xf32, #tpu.memory_space<vmem>>, vector<2x8xf32>,
    %300 = vector.extract_strided_slice %12 {offsets = [14, 0], sizes = [2, 128], strides = [1, 1]} : vector<16x128xf32> to vector<2x128xf32>
    %cst_66 = arith.constant dense<0.000000e+00> : vector<2x128xf32>
    %301 = tpu.matmul %274, %2, %cst_66 {dimension_numbers = #tpu.dot_dimension_numbers<[1], [0], [0], [1], [0, 0, 1, 1], [], []>} : vector<2x32xbf16>, vector<32x128xbf16>, vector<2x128xf32> -> vector<2x128xf32>
    %302 = arith.addf %300, %301 : vector<2x128xf32>
    %303 = arith.negf %302 : vector<2x128xf32>
    %304 = math.exp %303 : vector<2x128xf32>
    %cst_67 = arith.constant 1.000000e+00 : f32
    %305 = vector.broadcast %cst_67 : f32 to vector<2x128xf32>
    %306 = arith.addf %305, %304 : vector<2x128xf32>
    %307 = arith.divf %305, %306 : vector<2x128xf32>
    %308 = vector.extract_strided_slice %307 {offsets = [0, 0], sizes = [2, 32], strides = [1, 1]} : vector<2x128xf32> to vector<2x32xf32>
    %309 = vector.extract_strided_slice %307 {offsets = [0, 32], sizes = [2, 32], strides = [1, 1]} : vector<2x128xf32> to vector<2x32xf32>
    %310 = vector.extract_strided_slice %307 {offsets = [0, 96], sizes = [2, 32], strides = [1, 1]} : vector<2x128xf32> to vector<2x32xf32>
    %311 = vector.extract_strided_slice %302 {offsets = [0, 64], sizes = [2, 32], strides = [1, 1]} : vector<2x128xf32> to vector<2x32xf32>
    %312 = math.tanh %311 : vector<2x32xf32>
    %313 = arith.mulf %309, %271 : vector<2x32xf32>
    %314 = arith.mulf %308, %312 : vector<2x32xf32>
    %315 = arith.addf %313, %314 : vector<2x32xf32>
    %316 = math.tanh %315 : vector<2x32xf32>
    %317 = arith.mulf %310, %316 : vector<2x32xf32>
    %318 = arith.truncf %317 : vector<2x32xf32> to vector<2x32xbf16>
    %cst_68 = arith.constant dense<0.000000e+00> : vector<2x128xf32>
    %319 = tpu.matmul %274, %1, %cst_68 {dimension_numbers = #tpu.dot_dimension_numbers<[1], [0], [0], [1], [0, 0, 1, 1], [], []>} : vector<2x32xbf16>, vector<32x128xbf16>, vector<2x128xf32> -> vector<2x128xf32>
    %cst_69 = arith.constant dense<0.000000e+00> : vector<2x128xf32>
    %320 = tpu.matmul %295, %3, %cst_69 {dimension_numbers = #tpu.dot_dimension_numbers<[1], [0], [0], [1], [0, 0, 1, 1], [], []>} : vector<2x32xbf16>, vector<32x128xbf16>, vector<2x128xf32> -> vector<2x128xf32>
    %321 = arith.addf %319, %320 : vector<2x128xf32>
    %322 = vector.broadcast %5 : vector<1x128xf32> to vector<2x128xf32>
    %323 = arith.addf %321, %322 : vector<2x128xf32>
    %324 = arith.negf %323 : vector<2x128xf32>
    %325 = math.exp %324 : vector<2x128xf32>
    %cst_70 = arith.constant 1.000000e+00 : f32
    %326 = vector.broadcast %cst_70 : f32 to vector<2x128xf32>
    %327 = arith.addf %326, %325 : vector<2x128xf32>
    %328 = arith.divf %326, %327 : vector<2x128xf32>
    %329 = vector.extract_strided_slice %328 {offsets = [0, 0], sizes = [2, 32], strides = [1, 1]} : vector<2x128xf32> to vector<2x32xf32>
    %330 = vector.extract_strided_slice %328 {offsets = [0, 32], sizes = [2, 32], strides = [1, 1]} : vector<2x128xf32> to vector<2x32xf32>
    %331 = vector.extract_strided_slice %328 {offsets = [0, 96], sizes = [2, 32], strides = [1, 1]} : vector<2x128xf32> to vector<2x32xf32>
    %332 = vector.extract_strided_slice %323 {offsets = [0, 64], sizes = [2, 32], strides = [1, 1]} : vector<2x128xf32> to vector<2x32xf32>
    %333 = math.tanh %332 : vector<2x32xf32>
    %334 = arith.mulf %330, %292 : vector<2x32xf32>
    %335 = arith.mulf %329, %333 : vector<2x32xf32>
    %336 = arith.addf %334, %335 : vector<2x32xf32>
    %337 = math.tanh %336 : vector<2x32xf32>
    %338 = arith.mulf %331, %337 : vector<2x32xf32>
    %339 = arith.truncf %338 : vector<2x32xf32> to vector<2x32xbf16>
    %cst_71 = arith.constant dense<0.000000e+00> : vector<2x8xf32>
    %340 = tpu.matmul %339, %6, %cst_71 {dimension_numbers = #tpu.dot_dimension_numbers<[1], [0], [0], [1], [0, 0, 1, 1], [], []>} : vector<2x32xbf16>, vector<32x8xbf16>, vector<2x8xf32> -> vector<2x8xf32>
    %341 = vector.broadcast %7 : vector<1x8xf32> to vector<2x8xf32>
    %342 = arith.addf %340, %341 : vector<2x8xf32>
    %c12 = arith.constant 12 : index
    %c0_72 = arith.constant 0 : index
    %343 = vector.load %arg9[%c12, %c0_72] : memref<16x8xf32, #tpu.memory_space<vmem>>, vector<2x8xf32>
    tpu.vector_store %arg9[%c12, %c0_72], %342 {strides = array<i32>} : memref<16x8xf32, #tpu.memory_space<vmem>>, vector<2x8xf32>,
    %cst_73 = arith.constant dense<0.000000e+00> : vector<2x128xf32>
    %344 = tpu.matmul %318, %1, %cst_73 {dimension_numbers = #tpu.dot_dimension_numbers<[1], [0], [0], [1], [0, 0, 1, 1], [], []>} : vector<2x32xbf16>, vector<32x128xbf16>, vector<2x128xf32> -> vector<2x128xf32>
    %cst_74 = arith.constant dense<0.000000e+00> : vector<2x128xf32>
    %345 = tpu.matmul %339, %3, %cst_74 {dimension_numbers = #tpu.dot_dimension_numbers<[1], [0], [0], [1], [0, 0, 1, 1], [], []>} : vector<2x32xbf16>, vector<32x128xbf16>, vector<2x128xf32> -> vector<2x128xf32>
    %346 = arith.addf %344, %345 : vector<2x128xf32>
    %347 = vector.broadcast %5 : vector<1x128xf32> to vector<2x128xf32>
    %348 = arith.addf %346, %347 : vector<2x128xf32>
    %349 = arith.negf %348 : vector<2x128xf32>
    %350 = math.exp %349 : vector<2x128xf32>
    %cst_75 = arith.constant 1.000000e+00 : f32
    %351 = vector.broadcast %cst_75 : f32 to vector<2x128xf32>
    %352 = arith.addf %351, %350 : vector<2x128xf32>
    %353 = arith.divf %351, %352 : vector<2x128xf32>
    %354 = vector.extract_strided_slice %353 {offsets = [0, 0], sizes = [2, 32], strides = [1, 1]} : vector<2x128xf32> to vector<2x32xf32>
    %355 = vector.extract_strided_slice %353 {offsets = [0, 32], sizes = [2, 32], strides = [1, 1]} : vector<2x128xf32> to vector<2x32xf32>
    %356 = vector.extract_strided_slice %353 {offsets = [0, 96], sizes = [2, 32], strides = [1, 1]} : vector<2x128xf32> to vector<2x32xf32>
    %357 = vector.extract_strided_slice %348 {offsets = [0, 64], sizes = [2, 32], strides = [1, 1]} : vector<2x128xf32> to vector<2x32xf32>
    %358 = math.tanh %357 : vector<2x32xf32>
    %359 = arith.mulf %355, %336 : vector<2x32xf32>
    %360 = arith.mulf %354, %358 : vector<2x32xf32>
    %361 = arith.addf %359, %360 : vector<2x32xf32>
    %362 = math.tanh %361 : vector<2x32xf32>
    %363 = arith.mulf %356, %362 : vector<2x32xf32>
    %364 = arith.truncf %363 : vector<2x32xf32> to vector<2x32xbf16>
    %cst_76 = arith.constant dense<0.000000e+00> : vector<2x8xf32>
    %365 = tpu.matmul %364, %6, %cst_76 {dimension_numbers = #tpu.dot_dimension_numbers<[1], [0], [0], [1], [0, 0, 1, 1], [], []>} : vector<2x32xbf16>, vector<32x8xbf16>, vector<2x8xf32> -> vector<2x8xf32>
    %366 = vector.broadcast %7 : vector<1x8xf32> to vector<2x8xf32>
    %367 = arith.addf %365, %366 : vector<2x8xf32>
    %c14 = arith.constant 14 : index
    %c0_77 = arith.constant 0 : index
    %368 = vector.load %arg9[%c14, %c0_77] : memref<16x8xf32, #tpu.memory_space<vmem>>, vector<2x8xf32>
    tpu.vector_store %arg9[%c14, %c0_77], %367 {strides = array<i32>} : memref<16x8xf32, #tpu.memory_space<vmem>>, vector<2x8xf32>,
    return
  }
}

</mosaic_0001>

<bundles_post_ra>
// kernel: lstm_forward.1
= control target key start
LH: loop header
LB: loop body
LE: loop exit
PB: predicated region body
PF: predicated region fallthrough
CT: control target
= control target key end

     0   :  { %14 = vsyncpa [#allocation3], 0  ;;  %s2640_s30 = smov [#allocation2]   ;;  %s3197_s0 = inlined_call_operand.vmem [shape: f32[16,16], index: 0, kind: input, shape index: {}]   ;;  %s3198_s1 = inlined_call_operand.hbm [shape: bf16[16,128], index: 1, kind: input, shape index: {}]   ;;  %s3199_s2 = inlined_call_operand.vmem [shape: bf16[32,128], index: 2, kind: input, shape index: {}]   ;;  %s3200_s3 = inlined_call_operand.vmem [shape: f32[1,128], index: 3, kind: input, shape index: {}]   ;;  %s3201_s4 = inlined_call_operand.vmem [shape: bf16[32,128], index: 4, kind: input, shape index: {}]   ;;  %s3202_s5 = inlined_call_operand.vmem [shape: bf16[32,128], index: 5, kind: input, shape index: {}]   ;;  %s3203_s6 = inlined_call_operand.vmem [shape: f32[1,128], index: 6, kind: input, shape index: {}]   ;;  %s3204_s7 = inlined_call_operand.vmem [shape: bf16[32,8], index: 7, kind: input, shape index: {}]   ;;  %s3205_s8 = inlined_call_operand.vmem [shape: f32[1,8], index: 8, kind: input, shape index: {}]   ;;  %s3206_s9 = inlined_call_operand.vmem [shape: f32[16,8], index: 9, kind: output, shape index: {}]  }
   0x1   :  { %s22_s10 = sshll.u32 %s2640_s30, 4  ;;  %s2616_s13 = scalar_lea.hbm %s3198_s1, 128  ;;  %s23_s10 = int_to_ptr.vmem [resolvable:$true] %s22_s10 }
   0x2   :  { %p2617_p0 = scmp.ne.s32.totalorder %s3198_s1, %s2616_s13  ;;  %p2620_p1 = scmp.lt.u32.totalorder %s2616_s13, %s3198_s1 }
   0x4   :  { %p2622_p2 = pnand %p2620_p1, %p2617_p0 }
   0x6   :  { %2625 = shalt.err (!%p2622_p2)
}
   0x7   :  { %s2626_s18 = scalar_lea.vmem %s23_s10, 128  ;;  %p2631_p4 = scmp.lt.s32.totalorder %s23_s10, %s23_s10 }
   0x8   :  { %p2627_p3 = scmp.ne.s32.totalorder %s23_s10, %s2626_s18  ;;  %p2632_p5 = scmp.lt.s32.totalorder %s2626_s18, %s2626_s18 }
   0xa   :  { %p2633_p6 = por %p2632_p5, %p2631_p4 }
   0xc   :  { %p2634_p7 = pnand %p2633_p6, %p2627_p3 }
   0xe   :  { %2637 = shalt.err (!%p2634_p7)
}
   0xf   :  { %s2641_s19 = smov 64   ;;  %s2642_s20 = smov 4  }
  0x10   :  { %28 = dma.hbm_to_vmem [thread:$0]  %s3198_s1, 128, %s23_s10, [#allocation3], %s2641_s19, %s2641_s19, %s2642_s20  }
  0x11   :  { %2638 = dma.done.wait [#allocation3], 128  }
  0x12   :  { %2639 = vsyncadd [#allocation3], 4294967168  ;;  %v2643_v0 = vmov 0.0   ;;  %vm2644_vm0 = vmmov 0   ;;  %v2469_v1 = vld [vmem:[#allocation2] sm:$0xff]   ;;  %v69_v4 = vld [vmem:[%s3197_s0 + $0x8] sm:$0xff] }
  0x13   :  { %2200 = vmatprep.subr.bf16.mxu0 %v2643_v0  ;;  %2206 = vmatprep.subr.bf16.mxu1 %v2643_v0  ;;  %v2720_v2 = vld [vmem:[%s3199_s2] sm:$0xff]   ;;  %vm83_vm1 = vcmask 130048   ;;  %v2732_v6 = vld [vmem:[%s3199_s2 + $0x8] sm:$0xff]   ;;  %v2645_v7 = vmov 0   ;;  %vm140_vm2 = vcmask 261120   ;;  %vm488_vm3 = vcmask 58368  }
  0x14   :  { %2202 = vmatprep.mubr.msk.bf16.mxu0 %vm2644_vm0, %v2643_v0  ;;  %2210 = vmatprep.mubr.msk.bf16.mxu1 %vm2644_vm0, %v2643_v0  ;;  %v68_v3 = vld [vmem:[%s3197_s0] sm:$0xff]  ;;  %v2770_v32 = vld [vmem:[%s3202_s5 + $0x8] sm:$0xff]  }
  0x15   :  { %2201 = vmatpush3.bf16.msra.mxu0 %v2469_v1  ;;  %2207 = vmatpush3.bf16.msra.mxu1 %v2720_v2  ;;  %v70_v5 = vpack.c.bf16 %v69_v4, %v68_v3  ;;  %v2043_v8 = vld [vmem:[%s3200_s3] ss:$0 sm:$0xff]  ;;  %s2646_s3 = smov 32   ;;  %v2787_v38 = vld [vmem:[%s3201_s4 + $0x8] sm:$0xff]  }
  0x16   :  { %2214 = vmatprep.subr.bf16.mxu0 %v2643_v0  ;;  %2208 = vmatprep.subr.bf16.mxu1 %v2643_v0  ;;  %v2762_v30 = vld [vmem:[%s3202_s5] sm:$0xff]  }
  0x17   :  { %v2780_v36 = vld [vmem:[%s3201_s4] sm:$0xff]  }
  0x18   :  { %2203 = vmatmul.mubr.msk.bf16.vlgmr.msra.gmra.mrb[0].mxu0 %vm83_vm1, %v70_v5  ;;  %v2805_v49 = vld [vmem:[%s3203_s6] ss:$0 sm:$0xff] }
  0x19   :  { %2215 = vmatpush3.bf16.msra.mxu0 %v2720_v2  ;;  %2218 = vmatprep.mubr.msk.bf16.mxu0 %vm2644_vm0, %v2643_v0 }
  0x1a   :  { %2209 = vmatpush3.bf16.msra.mxu1 %v2732_v6  ;;  %2216 = vmatprep.subr.bf16.mxu0 %v2643_v0 }
  0x1b   :  { %2222 = vmatprep.subr.bf16.mxu1 %v2643_v0 }
  0x1d   :  { %2211 = vmatmul.mubr.bf16.vlgmr.msra.gmra.mrb[0].mxu1 %v2645_v7  ;;  %2217 = vmatpush3.bf16.msra.mxu0 %v2732_v6 }
  0x1e   :  { %2230 = vmatprep.subr.bf16.mxu0 %v2643_v0  ;;  %2226 = vmatprep.mubr.msk.bf16.mxu1 %vm2644_vm0, %v2643_v0 }
  0x1f   :  { %2223 = vmatpush3.bf16.msra.mxu1 %v2762_v30 }
  0x20   :  { %2224 = vmatprep.subr.bf16.mxu1 %v2643_v0 }
  0x23   :  { %2225 = vmatpush3.bf16.msra.mxu1 %v2770_v32 }
  0x24   :  { %2238 = vmatprep.subr.bf16.mxu1 %v2643_v0 }
  0x26   :  { %2227 = vmatmul.mubr.bf16.vlgmr.msra.gmra.mrb[4].mxu1 %v2645_v7 }
  0x27   :  { %2242 = vmatprep.mubr.msk.bf16.mxu1 %vm2644_vm0, %v2643_v0 }
  0xeb   :  { %v121_v9 = vpop.f32.mrb[0].mxu0 }
  0xec   :  { %v2204_v10 = vpop.f32.mrb[1].mxu0  ;;  %v2749_v11 = vadd.f32 %v2043_v8, %v121_v9 }
  0xed   :  { %v124_v12 = vpop.f32.mrb[2].mxu0 }
  0xee   :  { %v2751_v13 = vadd.f32 %v2043_v8, %v124_v12  ;;  %v2205_v14 = vpop.f32.mrb[3].mxu0 }
  0xf0   :  { %v178_v15 = vpop.f32.mrb[0].mxu1 }
  0xf1   :  { %v184_v16 = vadd.f32 %v178_v15, %v2749_v11  ;;  %v2212_v17 = vpop.f32.mrb[1].mxu1 }
  0xf2   :  { %v181_v18 = vpop.f32.mrb[2].mxu1 }
  0xf3   :  { %v2213_v19 = vpop.f32.mrb[3].mxu1  ;;  %2478 = vtanh.f32 %v184_v16  ;;  %v2048_v21 = vmul.f32 -1.442695, %v184_v16 }
  0xf4   :  { %v2822_v19 = vld [vmem:[%s3204_s7] sm:$0xff]  }
  0xf5   :  { %2480 = vpow2.f32 %v2048_v21  ;;  %2239 = vmatpush3.bf16.msra.mxu1 %v2822_v19  ;;  %v2831_v21 = vld [vmem:[%s3204_s7 + $0x8] sm:$0xff]  }
  0xf6   :  { %2240 = vmatprep.subr.bf16.mxu1 %v2643_v0 }
  0xf9   :  { %v334_v39 = vpop.f32.mrb[4].mxu1  ;;  %2241 = vmatpush3.bf16.msra.mxu1 %v2831_v21 }
  0xfa   :  { %v2228_v40 = vpop.f32.mrb[5].mxu1  ;;  %2254 = vmatprep.subr.bf16.mxu1 %v2643_v0 }
  0xfb   :  { %v337_v41 = vpop.f32.mrb[6].mxu1 }
  0xfc   :  { %v2229_v42 = vpop.f32.mrb[7].mxu1  ;;  %v2869_v41 = vld [vmem:[%s3205_s8] ss:$0 sm:$0xff] }
  0xfd   :  { %v2479_v20 = vpop.eup %2478 }
  0xfe   :  { %194 = vrot.lane.b32.xlu0 %v2479_v20, %s2641_s19 }
  0xff   :  { %v2481_v22 = vpop.eup %2480 }
 0x100   :  { %v188_v23 = vadd.f32 1.0, %v2481_v22 }
 0x102   :  { %2482 = vrcp.f32 %v188_v23 }
 0x10c   :  { %v2483_v24 = vpop.eup %2482 }
 0x10d   :  { %v192_v27 = vmul.f32 0.0, %v2483_v24 }
 0x170   :  { %v195_v25 = vpop.permute.xlu0 %194 }
 0x171   :  { %v197_v26 = vmul.f32 %v2483_v24, %v195_v25 }
 0x173   :  { %199 = vrot.lane.b32.xlu0 %v197_v26, %s2646_s3 }
 0x1e5   :  { %v200_v28 = vpop.permute.xlu0 %199 }
 0x1e6   :  { %v2756_v29 = vadd.f32 %v200_v28, %v192_v27 }
 0x1e8   :  { %2484 = vtanh.f32 %v2756_v29  ;;  %v268_v9 = vrot.slane %v2756_v29, 6 }
 0x1f2   :  { %v2485_v31 = vpop.eup %2484 }
 0x1f3   :  { %205 = vrot.lane.b32.xlu1 %v2485_v31, %s2641_s19 }
 0x265   :  { %v206_v33 = vpop.permute.xlu1 %205 }
 0x266   :  { %v208_v34 = vmul.f32 %v2483_v24, %v206_v33 }
 0x268   :  { %v209_v35 = vpack.c.bf16 %v208_v34, %v208_v34 }
 0x26a   :  { %211 = vrot.lane.b32.xlu1 %v209_v35, %s2646_s3 }
 0x2dc   :  { %v212_v37 = vpop.permute.xlu1 %211 }
 0x2dd   :  { %2219 = vmatmul.mubr.msk.bf16.vlgmr.msra.gmra.mrb[4].mxu0 %vm140_vm2, %v212_v37 }
 0x2de   :  { %2231 = vmatpush3.bf16.msra.mxu0 %v2780_v36  ;;  %2234 = vmatprep.mubr.msk.bf16.mxu0 %vm2644_vm0, %v2643_v0 }
 0x2df   :  { %2232 = vmatprep.subr.bf16.mxu0 %v2643_v0 }
 0x2e2   :  { %2233 = vmatpush3.bf16.msra.mxu0 %v2787_v38 }
 0x2e3   :  { %2246 = vmatprep.subr.bf16.mxu0 %v2643_v0 }
 0x2e5   :  { %2235 = vmatmul.mubr.msk.bf16.vlgmr.msra.gmra.mrb[8].mxu0 %vm140_vm2, %v212_v37 }
 0x2e6   :  { %2247 = vmatpush3.bf16.msra.mxu0 %v2720_v2  ;;  %2250 = vmatprep.mubr.msk.bf16.mxu0 %vm2644_vm0, %v2643_v0 }
 0x2e7   :  { %2248 = vmatprep.subr.bf16.mxu0 %v2643_v0 }
 0x2ea   :  { %2249 = vmatpush3.bf16.msra.mxu0 %v2732_v6 }
 0x2eb   :  { %2262 = vmatprep.subr.bf16.mxu0 %v2643_v0 }
 0x3b0   :  { %v250_v43 = vpop.f32.mrb[4].mxu0 }
 0x3b1   :  { %v257_v44 = vrot.slane %v250_v43, 6  ;;  %v2220_v45 = vpop.f32.mrb[5].mxu0 }
 0x3b2   :  { %v253_v46 = vpop.f32.mrb[6].mxu0 }
 0x3b3   :  { %v259_v47 = vadd.f32 %v257_v44, %v2749_v11  ;;  %v2221_v48 = vpop.f32.mrb[7].mxu0 }
 0x3b5   :  { %2486 = vtanh.f32 %v259_v47  ;;  %v2050_v58 = vmul.f32 -1.442695, %v259_v47 }
 0x3b8   :  { %v386_v50 = vpop.f32.mrb[8].mxu0 }
 0x3b9   :  { %v387_v51 = vadd.f32 %v386_v50, %v334_v39  ;;  %v2236_v52 = vpop.f32.mrb[9].mxu0 }
 0x3ba   :  { %v389_v53 = vpop.f32.mrb[10].mxu0 }
 0x3bb   :  { %v398_v54 = vadd.f32 %v2805_v49, %v387_v51  ;;  %v2237_v55 = vpop.f32.mrb[11].mxu0 }
 0x3bd   :  { %2488 = vtanh.f32 %v398_v54  ;;  %v2057_v59 = vmul.f32 -1.442695, %v398_v54 }
 0x3be   :  { %2490 = vpow2.f32 %v2050_v58 }
 0x3bf   :  { %v2487_v56 = vpop.eup %2486  ;;  %2492 = vpow2.f32 %v2057_v59 }
 0x3c0   :  { %272 = vrot.lane.b32.xlu0 %v2487_v56, %s2641_s19 }
 0x3c7   :  { %v2489_v57 = vpop.eup %2488 }
 0x3c8   :  { %408 = vrot.lane.b32.xlu1 %v2489_v57, %s2641_s19  ;;  %v2491_v60 = vpop.eup %2490 }
 0x3c9   :  { %v263_v61 = vadd.f32 1.0, %v2491_v60  ;;  %v2493_v62 = vpop.eup %2492 }
 0x3ca   :  { %v402_v63 = vadd.f32 1.0, %v2493_v62 }
 0x3cb   :  { %2494 = vrcp.f32 %v263_v61 }
 0x3cc   :  { %2496 = vrcp.f32 %v402_v63 }
 0x3d5   :  { %v2495_v1 = vpop.eup %2494 }
 0x3d6   :  { %v2497_v5 = vpop.eup %2496  ;;  %v270_v10 = vmul.f32 %v2495_v1, %v268_v9 }
 0x3d7   :  { %v406_v15 = vmul.f32 0.0, %v2497_v5 }
 0x432   :  { %v273_v3 = vpop.permute.xlu0 %272 }
 0x433   :  { %v275_v4 = vmul.f32 %v2495_v1, %v273_v3 }
 0x435   :  { %277 = vrot.lane.b32.xlu0 %v275_v4, %s2646_s3 }
 0x43a   :  { %v409_v7 = vpop.permute.xlu1 %408 }
 0x43b   :  { %v411_v8 = vmul.f32 %v2497_v5, %v409_v7 }
 0x43d   :  { %413 = vrot.lane.b32.xlu1 %v411_v8, %s2646_s3 }
 0x4a7   :  { %v278_v12 = vpop.permute.xlu0 %277 }
 0x4a8   :  { %v2813_v14 = vadd.f32 %v278_v12, %v270_v10 }
 0x4aa   :  { %2498 = vtanh.f32 %v2813_v14  ;;  %v549_v12 = vrot.slane %v2813_v14, 6 }
 0x4af   :  { %v414_v16 = vpop.permute.xlu1 %413 }
 0x4b0   :  { %v2816_v17 = vadd.f32 %v414_v16, %v406_v15 }
 0x4b2   :  { %2500 = vtanh.f32 %v2816_v17 }
 0x4b4   :  { %v2499_v18 = vpop.eup %2498 }
 0x4b5   :  { %283 = vrot.lane.b32.xlu0 %v2499_v18, %s2641_s19 }
 0x4bc   :  { %v2501_v20 = vpop.eup %2500 }
 0x4bd   :  { %419 = vrot.lane.b32.xlu1 %v2501_v20, %s2641_s19 }
 0x527   :  { %v284_v22 = vpop.permute.xlu0 %283 }
 0x528   :  { %v286_v23 = vmul.f32 %v2495_v1, %v284_v22 }
 0x52a   :  { %v287_v24 = vpack.c.bf16 %v286_v23, %v286_v23 }
 0x52c   :  { %v491_v25 = vrot.slane %v287_v24, 1 }
 0x52e   :  { %492 = vrot.lane.b32.xlu1 %v491_v25, %s2646_s3 }
 0x52f   :  { %v420_v26 = vpop.permute.xlu1 %419 }
 0x530   :  { %v422_v27 = vmul.f32 %v2497_v5, %v420_v26 }
 0x532   :  { %v423_v28 = vpack.c.bf16 %v422_v27, %v422_v27 }
 0x534   :  { %431 = vrot.lane.b32.xlu0 %v423_v28, %s2646_s3 }
 0x5a0   :  { %v493_v29 = vpop.permute.xlu1 %492 }
 0x5a1   :  { %2251 = vmatmul.mubr.msk.bf16.vlgmr.msra.gmra.mrb[12].mxu0 %vm140_vm2, %v493_v29 }
 0x5a2   :  { %2263 = vmatpush3.bf16.msra.mxu0 %v2780_v36  ;;  %2266 = vmatprep.mubr.msk.bf16.mxu0 %vm2644_vm0, %v2643_v0 }
 0x5a3   :  { %2264 = vmatprep.subr.bf16.mxu0 %v2643_v0 }
 0x5a6   :  { %v432_v31 = vpop.permute.xlu0 %431  ;;  %2265 = vmatpush3.bf16.msra.mxu0 %v2787_v38 }
 0x5a7   :  { %2243 = vmatmul.mubr.msk.bf16.vlgmr.msra.gmra.mrb[8].mxu1 %vm140_vm2, %v432_v31  ;;  %2278 = vmatprep.subr.bf16.mxu0 %v2643_v0 }
 0x5a8   :  { %2255 = vmatpush3.bf16.msra.mxu1 %v2762_v30  ;;  %2258 = vmatprep.mubr.msk.bf16.mxu1 %vm2644_vm0, %v2643_v0 }
 0x5a9   :  { %2267 = vmatmul.mubr.msk.bf16.vlgmr.msra.gmra.mrb[16].mxu0 %vm140_vm2, %v493_v29  ;;  %2256 = vmatprep.subr.bf16.mxu1 %v2643_v0 }
 0x5aa   :  { %2279 = vmatpush3.bf16.msra.mxu0 %v2720_v2  ;;  %2282 = vmatprep.mubr.msk.bf16.mxu0 %vm2644_vm0, %v2643_v0 }
 0x5ab   :  { %2280 = vmatprep.subr.bf16.mxu0 %v2643_v0 }
 0x5ac   :  { %2257 = vmatpush3.bf16.msra.mxu1 %v2770_v32 }
 0x5ad   :  { %2270 = vmatprep.subr.bf16.mxu1 %v2643_v0 }
 0x5ae   :  { %2281 = vmatpush3.bf16.msra.mxu0 %v2732_v6 }
 0x5af   :  { %2259 = vmatmul.mubr.msk.bf16.vlgmr.msra.gmra.mrb[12].mxu1 %vm140_vm2, %v432_v31  ;;  %2294 = vmatprep.subr.bf16.mxu0 %v2643_v0 }
 0x5b0   :  { %2271 = vmatpush3.bf16.msra.mxu1 %v2822_v19  ;;  %2274 = vmatprep.mubr.msk.bf16.mxu1 %vm2644_vm0, %v2643_v0 }
 0x5b1   :  { %2272 = vmatprep.subr.bf16.mxu1 %v2643_v0 }
 0x5b4   :  { %2273 = vmatpush3.bf16.msra.mxu1 %v2831_v21 }
 0x5b5   :  { %2286 = vmatprep.subr.bf16.mxu1 %v2643_v0 }
 0x674   :  { %v531_v33 = vpop.f32.mrb[12].mxu0 }
 0x675   :  { %v538_v34 = vrot.slane %v531_v33, 4  ;;  %v2252_v35 = vpop.f32.mrb[13].mxu0 }
 0x676   :  { %v534_v37 = vpop.f32.mrb[14].mxu0 }
 0x677   :  { %v540_v39 = vadd.f32 %v538_v34, %v2749_v11  ;;  %v2253_v40 = vpop.f32.mrb[15].mxu0 }
 0x679   :  { %2502 = vtanh.f32 %v540_v39  ;;  %v2063_v60 = vmul.f32 -1.442695, %v540_v39 }
 0x67a   :  { %v482_v42 = vpop.f32.mrb[8].mxu1 }
 0x67b   :  { %v483_v43 = vadd.f32 %v2869_v41, %v482_v42  ;;  %v2244_v44 = vpop.f32.mrb[9].mxu1 }
 0x67c   :  { %v485_v45 = vpop.f32.mrb[10].mxu1  ;;  %v643_v46 = vpop.f32.mrb[16].mxu0 }
 0x67d   :  { %489 = vst.msk [vmem:[%s3206_s9] sm:$0x3] %vm488_vm3, %v483_v43  ;;  %v2245_v47 = vpop.f32.mrb[11].mxu1  ;;  %v2268_v48 = vpop.f32.mrb[17].mxu0 }
 0x67e   :  { %v646_v50 = vpop.f32.mrb[18].mxu0 }
 0x67f   :  { %v2269_v51 = vpop.f32.mrb[19].mxu0 }
 0x682   :  { %v603_v52 = vpop.f32.mrb[12].mxu1 }
 0x683   :  { %v2503_v53 = vpop.eup %2502  ;;  %v644_v54 = vadd.f32 %v643_v46, %v603_v52  ;;  %v2260_v55 = vpop.f32.mrb[13].mxu1 }
 0x684   :  { %v606_v56 = vpop.f32.mrb[14].mxu1  ;;  %553 = vrot.lane.b32.xlu0 %v2503_v53, %s2641_s19 }
 0x685   :  { %v649_v57 = vadd.f32 %v2805_v49, %v644_v54  ;;  %v2261_v58 = vpop.f32.mrb[15].mxu1 }
 0x687   :  { %2504 = vtanh.f32 %v649_v57  ;;  %v2066_v62 = vmul.f32 -1.442695, %v649_v57 }
 0x688   :  { %2506 = vpow2.f32 %v2063_v60 }
 0x689   :  { %2508 = vpow2.f32 %v2066_v62 }
 0x691   :  { %v2505_v59 = vpop.eup %2504 }
 0x692   :  { %659 = vrot.lane.b32.xlu1 %v2505_v59, %s2641_s19  ;;  %v2507_v61 = vpop.eup %2506 }
 0x693   :  { %v544_v63 = vadd.f32 1.0, %v2507_v61  ;;  %v2509_v1 = vpop.eup %2508 }
 0x694   :  { %v653_v4 = vadd.f32 1.0, %v2509_v1 }
 0x695   :  { %2510 = vrcp.f32 %v544_v63 }
 0x696   :  { %2512 = vrcp.f32 %v653_v4 }
 0x69f   :  { %v2511_v3 = vpop.eup %2510 }
 0x6a0   :  { %v2513_v8 = vpop.eup %2512  ;;  %v551_v15 = vmul.f32 %v2511_v3, %v549_v12 }
 0x6a1   :  { %v657_v22 = vmul.f32 %v2513_v8, %v2816_v17 }
 0x6f6   :  { %v554_v5 = vpop.permute.xlu0 %553 }
 0x6f7   :  { %v556_v7 = vmul.f32 %v2511_v3, %v554_v5 }
 0x6f9   :  { %558 = vrot.lane.b32.xlu0 %v556_v7, %s2646_s3 }
 0x704   :  { %v660_v9 = vpop.permute.xlu1 %659 }
 0x705   :  { %v662_v10 = vmul.f32 %v2513_v8, %v660_v9 }
 0x707   :  { %664 = vrot.lane.b32.xlu1 %v662_v10, %s2646_s3 }
 0x76b   :  { %v559_v16 = vpop.permute.xlu0 %558 }
 0x76c   :  { %v2882_v18 = vadd.f32 %v559_v16, %v551_v15 }
 0x76e   :  { %2514 = vtanh.f32 %v2882_v18  ;;  %v781_v15 = vrot.slane %v2882_v18, 6 }
 0x778   :  { %v2515_v20 = vpop.eup %2514 }
 0x779   :  { %564 = vrot.lane.b32.xlu0 %v2515_v20, %s2641_s19  ;;  %v665_v23 = vpop.permute.xlu1 %664 }
 0x77a   :  { %v2887_v24 = vadd.f32 %v665_v23, %v657_v22 }
 0x77c   :  { %2516 = vtanh.f32 %v2887_v24 }
 0x786   :  { %v2517_v25 = vpop.eup %2516 }
 0x787   :  { %670 = vrot.lane.b32.xlu1 %v2517_v25, %s2641_s19 }
 0x7eb   :  { %v565_v14 = vpop.permute.xlu0 %564 }
 0x7ec   :  { %v567_v26 = vmul.f32 %v2511_v3, %v565_v14 }
 0x7ee   :  { %v568_v27 = vpack.c.bf16 %v567_v26, %v567_v26 }
 0x7f0   :  { %v723_v28 = vrot.slane %v568_v27, 2 }
 0x7f2   :  { %724 = vrot.lane.b32.xlu1 %v723_v28, %s2646_s3 }
 0x7f9   :  { %v671_v29 = vpop.permute.xlu1 %670 }
 0x7fa   :  { %v673_v31 = vmul.f32 %v2513_v8, %v671_v29 }
 0x7fc   :  { %v674_v33 = vpack.c.bf16 %v673_v31, %v673_v31 }
 0x7fe   :  { %676 = vrot.lane.b32.xlu0 %v674_v33, %s2646_s3 }
 0x864   :  { %v725_v17 = vpop.permute.xlu1 %724 }
 0x865   :  { %2283 = vmatmul.mubr.msk.bf16.vlgmr.msra.gmra.mrb[20].mxu0 %vm140_vm2, %v725_v17 }
 0x866   :  { %2295 = vmatpush3.bf16.msra.mxu0 %v2780_v36  ;;  %2298 = vmatprep.mubr.msk.bf16.mxu0 %vm2644_vm0, %v2643_v0 }
 0x867   :  { %2296 = vmatprep.subr.bf16.mxu0 %v2643_v0 }
 0x86a   :  { %2297 = vmatpush3.bf16.msra.mxu0 %v2787_v38 }
 0x86b   :  { %2310 = vmatprep.subr.bf16.mxu0 %v2643_v0 }
 0x86d   :  { %2299 = vmatmul.mubr.msk.bf16.vlgmr.msra.gmra.mrb[24].mxu0 %vm140_vm2, %v725_v17 }
 0x86e   :  { %2311 = vmatpush3.bf16.msra.mxu0 %v2720_v2  ;;  %2314 = vmatprep.mubr.msk.bf16.mxu0 %vm2644_vm0, %v2643_v0 }
 0x86f   :  { %2312 = vmatprep.subr.bf16.mxu0 %v2643_v0 }
 0x870   :  { %v677_v34 = vpop.permute.xlu0 %676 }
 0x871   :  { %2275 = vmatmul.mubr.msk.bf16.vlgmr.msra.gmra.mrb[16].mxu1 %vm140_vm2, %v677_v34 }
 0x872   :  { %2287 = vmatpush3.bf16.msra.mxu1 %v2762_v30  ;;  %2290 = vmatprep.mubr.msk.bf16.mxu1 %vm2644_vm0, %v2643_v0 }
 0x873   :  { %2288 = vmatprep.subr.bf16.mxu1 %v2643_v0  ;;  %2313 = vmatpush3.bf16.msra.mxu0 %v2732_v6 }
 0x874   :  { %2326 = vmatprep.subr.bf16.mxu0 %v2643_v0 }
 0x876   :  { %2289 = vmatpush3.bf16.msra.mxu1 %v2770_v32 }
 0x877   :  { %2302 = vmatprep.subr.bf16.mxu1 %v2643_v0 }
 0x879   :  { %2291 = vmatmul.mubr.msk.bf16.vlgmr.msra.gmra.mrb[20].mxu1 %vm140_vm2, %v677_v34 }
 0x87a   :  { %2303 = vmatpush3.bf16.msra.mxu1 %v2822_v19  ;;  %2306 = vmatprep.mubr.msk.bf16.mxu1 %vm2644_vm0, %v2643_v0 }
 0x87b   :  { %2304 = vmatprep.subr.bf16.mxu1 %v2643_v0 }
 0x87e   :  { %2305 = vmatpush3.bf16.msra.mxu1 %v2831_v21 }
 0x87f   :  { %2318 = vmatprep.subr.bf16.mxu1 %v2643_v0 }
 0x938   :  { %v763_v35 = vpop.f32.mrb[20].mxu0 }
 0x939   :  { %v770_v37 = vrot.slane %v763_v35, 2  ;;  %v2284_v39 = vpop.f32.mrb[21].mxu0 }
 0x93a   :  { %v766_v40 = vpop.f32.mrb[22].mxu0 }
 0x93b   :  { %v772_v42 = vadd.f32 %v770_v37, %v2749_v11  ;;  %v2285_v43 = vpop.f32.mrb[23].mxu0 }
 0x93d   :  { %2518 = vtanh.f32 %v772_v42  ;;  %v2069_v61 = vmul.f32 -1.442695, %v772_v42 }
 0x940   :  { %v875_v44 = vpop.f32.mrb[24].mxu0 }
 0x941   :  { %v2300_v45 = vpop.f32.mrb[25].mxu0 }
 0x942   :  { %v878_v46 = vpop.f32.mrb[26].mxu0 }
 0x943   :  { %v2301_v47 = vpop.f32.mrb[27].mxu0 }
 0x944   :  { %v715_v48 = vpop.f32.mrb[16].mxu1 }
 0x945   :  { %v716_v50 = vadd.f32 %v2869_v41, %v715_v48  ;;  %v2276_v51 = vpop.f32.mrb[17].mxu1 }
 0x946   :  { %v718_v52 = vpop.f32.mrb[18].mxu1 }
 0x947   :  { %v2519_v53 = vpop.eup %2518  ;;  %721 = vst.msk [vmem:[%s3206_s9 + $0x2] sm:$0x3] %vm488_vm3, %v716_v50  ;;  %v2277_v54 = vpop.f32.mrb[19].mxu1 }
 0x948   :  { %785 = vrot.lane.b32.xlu0 %v2519_v53, %s2641_s19 }
 0x94c   :  { %v835_v11 = vpop.f32.mrb[20].mxu1 }
 0x94d   :  { %v876_v55 = vadd.f32 %v875_v44, %v835_v11  ;;  %v2292_v56 = vpop.f32.mrb[21].mxu1 }
 0x94e   :  { %v838_v57 = vpop.f32.mrb[22].mxu1 }
 0x94f   :  { %v881_v58 = vadd.f32 %v2805_v49, %v876_v55  ;;  %v2293_v59 = vpop.f32.mrb[23].mxu1 }
 0x951   :  { %2520 = vtanh.f32 %v881_v58  ;;  %v2072_v1 = vmul.f32 -1.442695, %v881_v58 }
 0x952   :  { %2522 = vpow2.f32 %v2069_v61 }
 0x95b   :  { %v2521_v60 = vpop.eup %2520 }
 0x95c   :  { %891 = vrot.lane.b32.xlu1 %v2521_v60, %s2641_s19  ;;  %v2523_v62 = vpop.eup %2522 }
 0x95d   :  { %v776_v63 = vadd.f32 1.0, %v2523_v62 }
 0x95f   :  { %2524 = vrcp.f32 %v776_v63 }
 0x960   :  { %2526 = vpow2.f32 %v2072_v1 }
 0x969   :  { %v2525_v3 = vpop.eup %2524 }
 0x96a   :  { %v2527_v7 = vpop.eup %2526  ;;  %v783_v16 = vmul.f32 %v2525_v3, %v781_v15 }
 0x96b   :  { %v885_v8 = vadd.f32 1.0, %v2527_v7 }
 0x96d   :  { %2528 = vrcp.f32 %v885_v8 }
 0x977   :  { %v2529_v9 = vpop.eup %2528 }
 0x978   :  { %v889_v25 = vmul.f32 %v2529_v9, %v2887_v24 }
 0x9ba   :  { %v786_v4 = vpop.permute.xlu0 %785 }
 0x9bb   :  { %v788_v5 = vmul.f32 %v2525_v3, %v786_v4 }
 0x9bd   :  { %790 = vrot.lane.b32.xlu0 %v788_v5, %s2646_s3 }
 0x9ce   :  { %v892_v10 = vpop.permute.xlu1 %891 }
 0x9cf   :  { %v894_v12 = vmul.f32 %v2529_v9, %v892_v10 }
 0x9d1   :  { %896 = vrot.lane.b32.xlu1 %v894_v12, %s2646_s3 }
 0xa2f   :  { %v791_v20 = vpop.permute.xlu0 %790 }
 0xa30   :  { %v2933_v22 = vadd.f32 %v791_v20, %v783_v16 }
 0xa32   :  { %2530 = vtanh.f32 %v2933_v22  ;;  %v1010_v15 = vrot.slane %v2933_v22, 6 }
 0xa3c   :  { %v2531_v23 = vpop.eup %2530 }
 0xa3d   :  { %796 = vrot.lane.b32.xlu0 %v2531_v23, %s2641_s19 }
 0xa43   :  { %v897_v14 = vpop.permute.xlu1 %896 }
 0xa44   :  { %v2938_v26 = vadd.f32 %v897_v14, %v889_v25 }
 0xa46   :  { %2532 = vtanh.f32 %v2938_v26 }
 0xa50   :  { %v2533_v27 = vpop.eup %2532 }
 0xa51   :  { %902 = vrot.lane.b32.xlu1 %v2533_v27, %s2641_s19 }
 0xaaf   :  { %v797_v18 = vpop.permute.xlu0 %796 }
 0xab0   :  { %v799_v28 = vmul.f32 %v2525_v3, %v797_v18 }
 0xab2   :  { %v800_v29 = vpack.c.bf16 %v799_v28, %v799_v28 }
 0xab4   :  { %v955_v31 = vrot.slane %v800_v29, 3 }
 0xab6   :  { %956 = vrot.lane.b32.xlu1 %v955_v31, %s2646_s3 }
 0xac3   :  { %v903_v33 = vpop.permute.xlu1 %902 }
 0xac4   :  { %v905_v17 = vmul.f32 %v2529_v9, %v903_v33 }
 0xac6   :  { %v906_v34 = vpack.c.bf16 %v905_v17, %v905_v17 }
 0xac8   :  { %908 = vrot.lane.b32.xlu0 %v906_v34, %s2646_s3 }
 0xb28   :  { %v957_v24 = vpop.permute.xlu1 %956 }
 0xb29   :  { %2315 = vmatmul.mubr.msk.bf16.vlgmr.msra.gmra.mrb[28].mxu0 %vm140_vm2, %v957_v24 }
 0xb2a   :  { %2327 = vmatpush3.bf16.msra.mxu0 %v2780_v36  ;;  %2330 = vmatprep.mubr.msk.bf16.mxu0 %vm2644_vm0, %v2643_v0 }
 0xb2b   :  { %2328 = vmatprep.subr.bf16.mxu0 %v2643_v0 }
 0xb2e   :  { %2329 = vmatpush3.bf16.msra.mxu0 %v2787_v38 }
 0xb2f   :  { %2342 = vmatprep.subr.bf16.mxu0 %v2643_v0 }
 0xb31   :  { %2331 = vmatmul.mubr.msk.bf16.vlgmr.msra.gmra.mrb[32].mxu0 %vm140_vm2, %v957_v24 }
 0xb32   :  { %2343 = vmatpush3.bf16.msra.mxu0 %v2720_v2  ;;  %2346 = vmatprep.mubr.msk.bf16.mxu0 %vm2644_vm0, %v2643_v0 }
 0xb33   :  { %2344 = vmatprep.subr.bf16.mxu0 %v2643_v0 }
 0xb36   :  { %2345 = vmatpush3.bf16.msra.mxu0 %v2732_v6 }
 0xb37   :  { %2358 = vmatprep.subr.bf16.mxu0 %v2643_v0 }
 0xb3a   :  { %v909_v35 = vpop.permute.xlu0 %908 }
 0xb3b   :  { %2307 = vmatmul.mubr.msk.bf16.vlgmr.msra.gmra.mrb[24].mxu1 %vm140_vm2, %v909_v35 }
 0xb3c   :  { %2319 = vmatpush3.bf16.msra.mxu1 %v2762_v30  ;;  %2322 = vmatprep.mubr.msk.bf16.mxu1 %vm2644_vm0, %v2643_v0 }
 0xb3d   :  { %2320 = vmatprep.subr.bf16.mxu1 %v2643_v0 }
 0xb40   :  { %2321 = vmatpush3.bf16.msra.mxu1 %v2770_v32 }
 0xb41   :  { %2334 = vmatprep.subr.bf16.mxu1 %v2643_v0 }
 0xb43   :  { %2323 = vmatmul.mubr.msk.bf16.vlgmr.msra.gmra.mrb[28].mxu1 %vm140_vm2, %v909_v35 }
 0xb44   :  { %2335 = vmatpush3.bf16.msra.mxu1 %v2822_v19  ;;  %2338 = vmatprep.mubr.msk.bf16.mxu1 %vm2644_vm0, %v2643_v0 }
 0xb45   :  { %2336 = vmatprep.subr.bf16.mxu1 %v2643_v0 }
 0xb48   :  { %2337 = vmatpush3.bf16.msra.mxu1 %v2831_v21 }
 0xb49   :  { %2350 = vmatprep.subr.bf16.mxu1 %v2643_v0 }
 0xbfc   :  { %v995_v37 = vpop.f32.mrb[28].mxu0 }
 0xbfd   :  { %v1001_v39 = vadd.f32 %v995_v37, %v2751_v13  ;;  %v2316_v40 = vpop.f32.mrb[29].mxu0 }
 0xbfe   :  { %v998_v42 = vpop.f32.mrb[30].mxu0 }
 0xbff   :  { %2534 = vtanh.f32 %v1001_v39  ;;  %v2317_v43 = vpop.f32.mrb[31].mxu0  ;;  %v2075_v61 = vmul.f32 -1.442695, %v1001_v39 }
 0xc04   :  { %v1104_v44 = vpop.f32.mrb[32].mxu0 }
 0xc05   :  { %v2332_v45 = vpop.f32.mrb[33].mxu0 }
 0xc06   :  { %v1107_v46 = vpop.f32.mrb[34].mxu0 }
 0xc07   :  { %v2333_v47 = vpop.f32.mrb[35].mxu0 }
 0xc09   :  { %v2535_v48 = vpop.eup %2534 }
 0xc0a   :  { %1014 = vrot.lane.b32.xlu0 %v2535_v48, %s2641_s19 }
 0xc0e   :  { %v947_v50 = vpop.f32.mrb[24].mxu1 }
 0xc0f   :  { %v948_v51 = vadd.f32 %v2869_v41, %v947_v50  ;;  %v2308_v52 = vpop.f32.mrb[25].mxu1 }
 0xc10   :  { %v950_v53 = vpop.f32.mrb[26].mxu1 }
 0xc11   :  { %953 = vst.msk [vmem:[%s3206_s9 + $0x4] sm:$0x3] %vm488_vm3, %v948_v51  ;;  %v2309_v54 = vpop.f32.mrb[27].mxu1 }
 0xc16   :  { %v1064_v11 = vpop.f32.mrb[28].mxu1 }
 0xc17   :  { %v1105_v55 = vadd.f32 %v1104_v44, %v1064_v11  ;;  %v2324_v56 = vpop.f32.mrb[29].mxu1 }
 0xc18   :  { %v1067_v57 = vpop.f32.mrb[30].mxu1 }
 0xc19   :  { %v1110_v58 = vadd.f32 %v2805_v49, %v1105_v55  ;;  %v2325_v59 = vpop.f32.mrb[31].mxu1 }
 0xc1b   :  { %2536 = vtanh.f32 %v1110_v58  ;;  %v2078_v1 = vmul.f32 -1.442695, %v1110_v58 }
 0xc1c   :  { %2538 = vpow2.f32 %v2075_v61 }
 0xc25   :  { %v2537_v60 = vpop.eup %2536 }
 0xc26   :  { %1120 = vrot.lane.b32.xlu1 %v2537_v60, %s2641_s19  ;;  %v2539_v62 = vpop.eup %2538 }
 0xc27   :  { %v1005_v63 = vadd.f32 1.0, %v2539_v62 }
 0xc29   :  { %2540 = vrcp.f32 %v1005_v63 }
 0xc2a   :  { %2542 = vpow2.f32 %v2078_v1 }
 0xc33   :  { %v2541_v3 = vpop.eup %2540 }
 0xc34   :  { %v2543_v7 = vpop.eup %2542  ;;  %v1012_v16 = vmul.f32 %v2541_v3, %v1010_v15 }
 0xc35   :  { %v1114_v8 = vadd.f32 1.0, %v2543_v7 }
 0xc37   :  { %2544 = vrcp.f32 %v1114_v8 }
 0xc41   :  { %v2545_v9 = vpop.eup %2544 }
 0xc42   :  { %v1118_v14 = vmul.f32 %v2545_v9, %v2938_v26 }
 0xc7c   :  { %v1015_v4 = vpop.permute.xlu0 %1014 }
 0xc7d   :  { %v1017_v5 = vmul.f32 %v2541_v3, %v1015_v4 }
 0xc7f   :  { %1019 = vrot.lane.b32.xlu0 %v1017_v5, %s2646_s3 }
 0xc98   :  { %v1121_v10 = vpop.permute.xlu1 %1120 }
 0xc99   :  { %v1123_v12 = vmul.f32 %v2545_v9, %v1121_v10 }
 0xc9b   :  { %1125 = vrot.lane.b32.xlu1 %v1123_v12, %s2646_s3 }
 0xcf1   :  { %v1020_v20 = vpop.permute.xlu0 %1019 }
 0xcf2   :  { %v2984_v23 = vadd.f32 %v1020_v20, %v1012_v16 }
 0xcf4   :  { %2546 = vtanh.f32 %v2984_v23  ;;  %v1241_v10 = vrot.slane %v2984_v23, 6 }
 0xcfe   :  { %v2547_v25 = vpop.eup %2546 }
 0xcff   :  { %1025 = vrot.lane.b32.xlu0 %v2547_v25, %s2641_s19 }
 0xd0d   :  { %v1126_v27 = vpop.permute.xlu1 %1125 }
 0xd0e   :  { %v2989_v18 = vadd.f32 %v1126_v27, %v1118_v14 }
 0xd10   :  { %2548 = vtanh.f32 %v2989_v18 }
 0xd1a   :  { %v2549_v28 = vpop.eup %2548 }
 0xd1b   :  { %1131 = vrot.lane.b32.xlu1 %v2549_v28, %s2641_s19 }
 0xd71   :  { %v1026_v22 = vpop.permute.xlu0 %1025 }
 0xd72   :  { %v1028_v29 = vmul.f32 %v2541_v3, %v1026_v22 }
 0xd74   :  { %v1029_v31 = vpack.c.bf16 %v1028_v29, %v1028_v29 }
 0xd76   :  { %1184 = vrot.lane.b32.xlu1 %v1029_v31, %s2646_s3 }
 0xd8d   :  { %v1132_v33 = vpop.permute.xlu1 %1131 }
 0xd8e   :  { %v1134_v17 = vmul.f32 %v2545_v9, %v1132_v33 }
 0xd90   :  { %v1135_v34 = vpack.c.bf16 %v1134_v17, %v1134_v17 }
 0xd92   :  { %1137 = vrot.lane.b32.xlu0 %v1135_v34, %s2646_s3 }
 0xde8   :  { %v1185_v24 = vpop.permute.xlu1 %1184 }
 0xde9   :  { %2347 = vmatmul.mubr.msk.bf16.vlgmr.msra.gmra.mrb[36].mxu0 %vm140_vm2, %v1185_v24 }
 0xdea   :  { %2359 = vmatpush3.bf16.msra.mxu0 %v2780_v36  ;;  %2362 = vmatprep.mubr.msk.bf16.mxu0 %vm2644_vm0, %v2643_v0 }
 0xdeb   :  { %2360 = vmatprep.subr.bf16.mxu0 %v2643_v0 }
 0xdee   :  { %2361 = vmatpush3.bf16.msra.mxu0 %v2787_v38 }
 0xdef   :  { %2374 = vmatprep.subr.bf16.mxu0 %v2643_v0 }
 0xdf1   :  { %2363 = vmatmul.mubr.msk.bf16.vlgmr.msra.gmra.mrb[40].mxu0 %vm140_vm2, %v1185_v24  ;;  %v2606_v24 = vld [vmem:[%s3199_s2] sm:$0xff]  }
 0xdf2   :  { %2375 = vmatpush3.bf16.msra.mxu0 %v2720_v2  ;;  %2378 = vmatprep.mubr.msk.bf16.mxu0 %vm2644_vm0, %v2643_v0 }
 0xdf3   :  { %2376 = vmatprep.subr.bf16.mxu0 %v2643_v0 }
 0xdf6   :  { %2377 = vmatpush3.bf16.msra.mxu0 %v2732_v6 }
 0xdf7   :  { %2390 = vmatprep.subr.bf16.mxu0 %v2643_v0 }
 0xe04   :  { %v1138_v26 = vpop.permute.xlu0 %1137 }
 0xe05   :  { %2339 = vmatmul.mubr.msk.bf16.vlgmr.msra.gmra.mrb[32].mxu1 %vm140_vm2, %v1138_v26 }
 0xe06   :  { %2351 = vmatpush3.bf16.msra.mxu1 %v2762_v30  ;;  %2354 = vmatprep.mubr.msk.bf16.mxu1 %vm2644_vm0, %v2643_v0 }
 0xe07   :  { %2352 = vmatprep.subr.bf16.mxu1 %v2643_v0 }
 0xe0a   :  { %2353 = vmatpush3.bf16.msra.mxu1 %v2770_v32 }
 0xe0b   :  { %2366 = vmatprep.subr.bf16.mxu1 %v2643_v0 }
 0xe0d   :  { %2355 = vmatmul.mubr.msk.bf16.vlgmr.msra.gmra.mrb[36].mxu1 %vm140_vm2, %v1138_v26 }
 0xe0e   :  { %2367 = vmatpush3.bf16.msra.mxu1 %v2822_v19  ;;  %2370 = vmatprep.mubr.msk.bf16.mxu1 %vm2644_vm0, %v2643_v0 }
 0xe0f   :  { %2368 = vmatprep.subr.bf16.mxu1 %v2643_v0 }
 0xe12   :  { %2369 = vmatpush3.bf16.msra.mxu1 %v2831_v21 }
 0xe13   :  { %2382 = vmatprep.subr.bf16.mxu1 %v2643_v0 }
 0xebc   :  { %v1223_v2 = vpop.f32.mrb[36].mxu0 }
 0xebd   :  { %v1230_v6 = vrot.slane %v1223_v2, 6  ;;  %v2348_v35 = vpop.f32.mrb[37].mxu0 }
 0xebe   :  { %v1226_v37 = vpop.f32.mrb[38].mxu0 }
 0xebf   :  { %v1232_v39 = vadd.f32 %v1230_v6, %v2751_v13  ;;  %v2349_v40 = vpop.f32.mrb[39].mxu0 }
 0xec1   :  { %2550 = vtanh.f32 %v1232_v39  ;;  %v2081_v59 = vmul.f32 -1.442695, %v1232_v39 }
 0xec4   :  { %v1335_v42 = vpop.f32.mrb[40].mxu0 }
 0xec5   :  { %v2364_v43 = vpop.f32.mrb[41].mxu0 }
 0xec6   :  { %v1338_v44 = vpop.f32.mrb[42].mxu0 }
 0xec7   :  { %v2365_v45 = vpop.f32.mrb[43].mxu0 }
 0xecb   :  { %v2551_v46 = vpop.eup %2550 }
 0xecc   :  { %1245 = vrot.lane.b32.xlu0 %v2551_v46, %s2641_s19 }
 0xed8   :  { %v1176_v47 = vpop.f32.mrb[32].mxu1 }
 0xed9   :  { %v1177_v48 = vadd.f32 %v2869_v41, %v1176_v47  ;;  %v2340_v50 = vpop.f32.mrb[33].mxu1 }
 0xeda   :  { %v1179_v51 = vpop.f32.mrb[34].mxu1 }
 0xedb   :  { %1182 = vst.msk [vmem:[%s3206_s9 + $0x6] sm:$0x3] %vm488_vm3, %v1177_v48  ;;  %v2341_v52 = vpop.f32.mrb[35].mxu1 }
 0xee0   :  { %v1295_v53 = vpop.f32.mrb[36].mxu1 }
 0xee1   :  { %v1336_v54 = vadd.f32 %v1335_v42, %v1295_v53  ;;  %v2356_v11 = vpop.f32.mrb[37].mxu1 }
 0xee2   :  { %v1298_v55 = vpop.f32.mrb[38].mxu1 }
 0xee3   :  { %v1341_v56 = vadd.f32 %v2805_v49, %v1336_v54  ;;  %v2357_v57 = vpop.f32.mrb[39].mxu1 }
 0xee5   :  { %2552 = vtanh.f32 %v1341_v56  ;;  %v2084_v3 = vmul.f32 -1.442695, %v1341_v56 }
 0xee6   :  { %2554 = vpow2.f32 %v2081_v59 }
 0xeef   :  { %v2553_v58 = vpop.eup %2552 }
 0xef0   :  { %1351 = vrot.lane.b32.xlu1 %v2553_v58, %s2641_s19  ;;  %v2555_v60 = vpop.eup %2554 }
 0xef1   :  { %v1236_v61 = vadd.f32 1.0, %v2555_v60 }
 0xef3   :  { %2556 = vrcp.f32 %v1236_v61 }
 0xef4   :  { %2558 = vpow2.f32 %v2084_v3 }
 0xefd   :  { %v2557_v62 = vpop.eup %2556 }
 0xefe   :  { %v2559_v4 = vpop.eup %2558  ;;  %v1243_v12 = vmul.f32 %v2557_v62, %v1241_v10 }
 0xeff   :  { %v1345_v5 = vadd.f32 1.0, %v2559_v4 }
 0xf01   :  { %2560 = vrcp.f32 %v1345_v5 }
 0xf0b   :  { %v2561_v7 = vpop.eup %2560 }
 0xf0c   :  { %v1349_v25 = vmul.f32 %v2561_v7, %v2989_v18 }
 0xf3e   :  { %v1246_v63 = vpop.permute.xlu0 %1245 }
 0xf3f   :  { %v1248_v1 = vmul.f32 %v2557_v62, %v1246_v63 }
 0xf41   :  { %1250 = vrot.lane.b32.xlu0 %v1248_v1, %s2646_s3 }
 0xf62   :  { %v1352_v8 = vpop.permute.xlu1 %1351 }
 0xf63   :  { %v1354_v9 = vmul.f32 %v2561_v7, %v1352_v8 }
 0xf65   :  { %1356 = vrot.lane.b32.xlu1 %v1354_v9, %s2646_s3 }
 0xfb3   :  { %v1251_v15 = vpop.permute.xlu0 %1250 }
 0xfb4   :  { %v3035_v16 = vadd.f32 %v1251_v15, %v1243_v12 }
 0xfb6   :  { %2562 = vtanh.f32 %v3035_v16  ;;  %v1473_v5 = vrot.slane %v3035_v16, 6 }
 0xfc0   :  { %v2563_v20 = vpop.eup %2562 }
 0xfc1   :  { %1256 = vrot.lane.b32.xlu0 %v2563_v20, %s2641_s19 }
 0xfd7   :  { %v1357_v14 = vpop.permute.xlu1 %1356 }
 0xfd8   :  { %v3040_v27 = vadd.f32 %v1357_v14, %v1349_v25 }
 0xfda   :  { %2564 = vtanh.f32 %v3040_v27 }
 0xfe4   :  { %v2565_v28 = vpop.eup %2564 }
 0xfe5   :  { %1362 = vrot.lane.b32.xlu1 %v2565_v28, %s2641_s19 }
0x1033   :  { %v1257_v23 = vpop.permute.xlu0 %1256 }
0x1034   :  { %v1259_v22 = vmul.f32 %v2557_v62, %v1257_v23 }
0x1036   :  { %v1260_v29 = vpack.c.bf16 %v1259_v22, %v1259_v22 }
0x1038   :  { %v1415_v31 = vrot.slane %v1260_v29, 1 }
0x103a   :  { %1416 = vrot.lane.b32.xlu1 %v1415_v31, %s2646_s3 }
0x1057   :  { %v1363_v33 = vpop.permute.xlu1 %1362 }
0x1058   :  { %v1365_v17 = vmul.f32 %v2561_v7, %v1363_v33  ;;  %v3105_v33 = vld [vmem:[%s3201_s4] sm:$0xff]  }
0x105a   :  { %v1366_v34 = vpack.c.bf16 %v1365_v17, %v1365_v17  ;;  %v3114_v17 = vld [vmem:[%s3201_s4 + $0x8] sm:$0xff]  }
0x105c   :  { %1368 = vrot.lane.b32.xlu0 %v1366_v34, %s2646_s3  ;;  %v2610_v34 = vld [vmem:[%s3202_s5] sm:$0xff]  }
0x10ac   :  { %v1417_v18 = vpop.permute.xlu1 %1416 }
0x10ad   :  { %2379 = vmatmul.mubr.msk.bf16.vlgmr.msra.gmra.mrb[44].mxu0 %vm140_vm2, %v1417_v18 }
0x10ae   :  { %2391 = vmatpush3.bf16.msra.mxu0 %v2780_v36  ;;  %2394 = vmatprep.mubr.msk.bf16.mxu0 %vm2644_vm0, %v2643_v0  ;;  %v2607_v36 = vld [vmem:[%s3199_s2 + $0x8] sm:$0xff]  }
0x10af   :  { %2392 = vmatprep.subr.bf16.mxu0 %v2643_v0 }
0x10b2   :  { %2393 = vmatpush3.bf16.msra.mxu0 %v2787_v38 }
0x10b3   :  { %2406 = vmatprep.subr.bf16.mxu0 %v2643_v0 }
0x10b5   :  { %2395 = vmatmul.mubr.msk.bf16.vlgmr.msra.gmra.mrb[48].mxu0 %vm140_vm2, %v1417_v18  ;;  %v2611_v18 = vld [vmem:[%s3202_s5 + $0x8] sm:$0xff]  }
0x10b6   :  { %2407 = vmatpush3.bf16.msra.mxu0 %v2606_v24  ;;  %2410 = vmatprep.mubr.msk.bf16.mxu0 %vm2644_vm0, %v2643_v0 }
0x10b7   :  { %2408 = vmatprep.subr.bf16.mxu0 %v2643_v0 }
0x10ba   :  { %2409 = vmatpush3.bf16.msra.mxu0 %v2607_v36 }
0x10bb   :  { %2422 = vmatprep.subr.bf16.mxu0 %v2643_v0 }
0x10ce   :  { %v1369_v38 = vpop.permute.xlu0 %1368 }
0x10cf   :  { %2371 = vmatmul.mubr.msk.bf16.vlgmr.msra.gmra.mrb[40].mxu1 %vm140_vm2, %v1369_v38 }
0x10d0   :  { %2383 = vmatpush3.bf16.msra.mxu1 %v2762_v30  ;;  %2386 = vmatprep.mubr.msk.bf16.mxu1 %vm2644_vm0, %v2643_v0 }
0x10d1   :  { %2384 = vmatprep.subr.bf16.mxu1 %v2643_v0 }
0x10d4   :  { %2385 = vmatpush3.bf16.msra.mxu1 %v2770_v32 }
0x10d5   :  { %2398 = vmatprep.subr.bf16.mxu1 %v2643_v0 }
0x10d7   :  { %2387 = vmatmul.mubr.msk.bf16.vlgmr.msra.gmra.mrb[44].mxu1 %vm140_vm2, %v1369_v38 }
0x10d8   :  { %2399 = vmatpush3.bf16.msra.mxu1 %v2822_v19  ;;  %2402 = vmatprep.mubr.msk.bf16.mxu1 %vm2644_vm0, %v2643_v0 }
0x10d9   :  { %2400 = vmatprep.subr.bf16.mxu1 %v2643_v0 }
0x10dc   :  { %2401 = vmatpush3.bf16.msra.mxu1 %v2831_v21 }
0x10dd   :  { %2414 = vmatprep.subr.bf16.mxu1 %v2643_v0 }
0x1180   :  { %v1455_v30 = vpop.f32.mrb[44].mxu0 }
0x1181   :  { %v1462_v26 = vrot.slane %v1455_v30, 4  ;;  %v2380_v2 = vpop.f32.mrb[45].mxu0 }
0x1182   :  { %v1458_v6 = vpop.f32.mrb[46].mxu0 }
0x1183   :  { %v1464_v32 = vadd.f32 %v1462_v26, %v2751_v13  ;;  %v2381_v35 = vpop.f32.mrb[47].mxu0 }
0x1185   :  { %2566 = vtanh.f32 %v1464_v32  ;;  %v2087_v56 = vmul.f32 -1.442695, %v1464_v32 }
0x1188   :  { %v1567_v37 = vpop.f32.mrb[48].mxu0 }
0x1189   :  { %v2396_v39 = vpop.f32.mrb[49].mxu0 }
0x118a   :  { %v1570_v40 = vpop.f32.mrb[50].mxu0 }
0x118b   :  { %v2397_v42 = vpop.f32.mrb[51].mxu0 }
0x118f   :  { %v2567_v43 = vpop.eup %2566 }
0x1190   :  { %1477 = vrot.lane.b32.xlu0 %v2567_v43, %s2641_s19 }
0x11a2   :  { %v1407_v44 = vpop.f32.mrb[40].mxu1 }
0x11a3   :  { %v1408_v45 = vadd.f32 %v2869_v41, %v1407_v44  ;;  %v2372_v46 = vpop.f32.mrb[41].mxu1 }
0x11a4   :  { %v1410_v47 = vpop.f32.mrb[42].mxu1 }
0x11a5   :  { %1413 = vst.msk [vmem:[%s3206_s9 + $0x8] sm:$0x3] %vm488_vm3, %v1408_v45  ;;  %v2373_v48 = vpop.f32.mrb[43].mxu1 }
0x11a6   :  { %v3151_v48 = vld [vmem:[%s3203_s6] ss:$0 sm:$0xff] }
0x11aa   :  { %v1527_v50 = vpop.f32.mrb[44].mxu1 }
0x11ab   :  { %v1568_v51 = vadd.f32 %v1567_v37, %v1527_v50  ;;  %v2388_v52 = vpop.f32.mrb[45].mxu1 }
0x11ac   :  { %v1530_v53 = vpop.f32.mrb[46].mxu1 }
0x11ad   :  { %v1573_v54 = vadd.f32 %v2805_v49, %v1568_v51  ;;  %v2389_v11 = vpop.f32.mrb[47].mxu1 }
0x11af   :  { %2568 = vtanh.f32 %v1573_v54  ;;  %v2090_v62 = vmul.f32 -1.442695, %v1573_v54 }
0x11b0   :  { %2570 = vpow2.f32 %v2087_v56 }
0x11b9   :  { %v2569_v55 = vpop.eup %2568 }
0x11ba   :  { %1583 = vrot.lane.b32.xlu1 %v2569_v55, %s2641_s19  ;;  %v2571_v57 = vpop.eup %2570 }
0x11bb   :  { %v1468_v58 = vadd.f32 1.0, %v2571_v57 }
0x11bd   :  { %2572 = vrcp.f32 %v1468_v58 }
0x11be   :  { %2574 = vpow2.f32 %v2090_v62 }
0x11c7   :  { %v2573_v59 = vpop.eup %2572 }
0x11c8   :  { %v2575_v63 = vpop.eup %2574  ;;  %v1475_v7 = vmul.f32 %v2573_v59, %v1473_v5 }
0x11c9   :  { %v1577_v1 = vadd.f32 1.0, %v2575_v63 }
0x11cb   :  { %2576 = vrcp.f32 %v1577_v1 }
0x11d5   :  { %v2577_v49 = vpop.eup %2576 }
0x11d6   :  { %v1581_v12 = vmul.f32 %v2577_v49, %v3040_v27 }
0x1202   :  { %v1478_v60 = vpop.permute.xlu0 %1477 }
0x1203   :  { %v1480_v61 = vmul.f32 %v2573_v59, %v1478_v60 }
0x1205   :  { %1482 = vrot.lane.b32.xlu0 %v1480_v61, %s2646_s3 }
0x122c   :  { %v1584_v3 = vpop.permute.xlu1 %1583 }
0x122d   :  { %v1586_v4 = vmul.f32 %v2577_v49, %v1584_v3 }
0x122f   :  { %1588 = vrot.lane.b32.xlu1 %v1586_v4, %s2646_s3 }
0x1277   :  { %v1483_v8 = vpop.permute.xlu0 %1482 }
0x1278   :  { %v3090_v9 = vadd.f32 %v1483_v8, %v1475_v7 }
0x127a   :  { %2578 = vtanh.f32 %v3090_v9  ;;  %v1705_v63 = vrot.slane %v3090_v9, 6 }
0x1284   :  { %v2579_v10 = vpop.eup %2578 }
0x1285   :  { %1488 = vrot.lane.b32.xlu0 %v2579_v10, %s2641_s19 }
0x12a1   :  { %v1589_v15 = vpop.permute.xlu1 %1588 }
0x12a2   :  { %v3095_v20 = vadd.f32 %v1589_v15, %v1581_v12 }
0x12a4   :  { %2580 = vtanh.f32 %v3095_v20 }
0x12ae   :  { %v2581_v25 = vpop.eup %2580 }
0x12af   :  { %1594 = vrot.lane.b32.xlu1 %v2581_v25, %s2641_s19 }
0x12f7   :  { %v1489_v16 = vpop.permute.xlu0 %1488 }
0x12f8   :  { %v1491_v14 = vmul.f32 %v2573_v59, %v1489_v16 }
0x12fa   :  { %v1492_v28 = vpack.c.bf16 %v1491_v14, %v1491_v14 }
0x12fc   :  { %v1647_v23 = vrot.slane %v1492_v28, 2 }
0x12fe   :  { %1648 = vrot.lane.b32.xlu1 %v1647_v23, %s2646_s3 }
0x1321   :  { %v1595_v22 = vpop.permute.xlu1 %1594 }
0x1322   :  { %v1597_v29 = vmul.f32 %v2577_v49, %v1595_v22  ;;  %v2614_v22 = vld [vmem:[%s3204_s7 + $0x8] sm:$0xff]  }
0x1324   :  { %v1598_v31 = vpack.c.bf16 %v1597_v29, %v1597_v29 }
0x1326   :  { %1600 = vrot.lane.b32.xlu0 %v1598_v31, %s2646_s3 }
0x1370   :  { %v1649_v27 = vpop.permute.xlu1 %1648 }
0x1371   :  { %2411 = vmatmul.mubr.msk.bf16.vlgmr.msra.gmra.mrb[52].mxu0 %vm140_vm2, %v1649_v27 }
0x1372   :  { %2423 = vmatpush3.bf16.msra.mxu0 %v3105_v33  ;;  %2426 = vmatprep.mubr.msk.bf16.mxu0 %vm2644_vm0, %v2643_v0 }
0x1373   :  { %2424 = vmatprep.subr.bf16.mxu0 %v2643_v0 }
0x1376   :  { %2425 = vmatpush3.bf16.msra.mxu0 %v3114_v17 }
0x1377   :  { %2438 = vmatprep.subr.bf16.mxu0 %v2643_v0 }
0x1379   :  { %2427 = vmatmul.mubr.msk.bf16.vlgmr.msra.gmra.mrb[56].mxu0 %vm140_vm2, %v1649_v27 }
0x137a   :  { %2439 = vmatpush3.bf16.msra.mxu0 %v2610_v34  ;;  %2442 = vmatprep.mubr.msk.bf16.mxu0 %vm2644_vm0, %v2643_v0 }
0x137b   :  { %2440 = vmatprep.subr.bf16.mxu0 %v2643_v0 }
0x137e   :  { %2441 = vmatpush3.bf16.msra.mxu0 %v2611_v18 }
0x137f   :  { %2454 = vmatprep.subr.bf16.mxu0 %v2643_v0 }
0x1398   :  { %v1601_v24 = vpop.permute.xlu0 %1600 }
0x1399   :  { %2403 = vmatmul.mubr.msk.bf16.vlgmr.msra.gmra.mrb[48].mxu1 %vm140_vm2, %v1601_v24 }
0x139a   :  { %2415 = vmatpush3.bf16.msra.mxu1 %v2610_v34  ;;  %2418 = vmatprep.mubr.msk.bf16.mxu1 %vm2644_vm0, %v2643_v0 }
0x139b   :  { %2416 = vmatprep.subr.bf16.mxu1 %v2643_v0 }
0x139e   :  { %2417 = vmatpush3.bf16.msra.mxu1 %v2611_v18 }
0x139f   :  { %2430 = vmatprep.subr.bf16.mxu1 %v2643_v0 }
0x13a1   :  { %2419 = vmatmul.mubr.msk.bf16.vlgmr.msra.gmra.mrb[52].mxu1 %vm140_vm2, %v1601_v24 }
0x13a2   :  { %2431 = vmatpush3.bf16.msra.mxu1 %v2822_v19  ;;  %2434 = vmatprep.mubr.msk.bf16.mxu1 %vm2644_vm0, %v2643_v0 }
0x13a3   :  { %2432 = vmatprep.subr.bf16.mxu1 %v2643_v0 }
0x13a6   :  { %2433 = vmatpush3.bf16.msra.mxu1 %v2831_v21 }
0x13a7   :  { %2446 = vmatprep.subr.bf16.mxu1 %v2643_v0 }
0x1444   :  { %v1687_v36 = vpop.f32.mrb[52].mxu0 }
0x1445   :  { %v1694_v38 = vrot.slane %v1687_v36, 2  ;;  %v2412_v30 = vpop.f32.mrb[53].mxu0 }
0x1446   :  { %v1690_v26 = vpop.f32.mrb[54].mxu0 }
0x1447   :  { %v1696_v2 = vadd.f32 %v1694_v38, %v2751_v13  ;;  %v2413_v6 = vpop.f32.mrb[55].mxu0 }
0x1449   :  { %2582 = vtanh.f32 %v1696_v2  ;;  %v2093_v52 = vmul.f32 -1.442695, %v1696_v2 }
0x144c   :  { %v1799_v32 = vpop.f32.mrb[56].mxu0 }
0x144d   :  { %v2428_v35 = vpop.f32.mrb[57].mxu0 }
0x144e   :  { %v1802_v19 = vpop.f32.mrb[58].mxu0 }
0x144f   :  { %v2429_v37 = vpop.f32.mrb[59].mxu0 }
0x1453   :  { %v2583_v39 = vpop.eup %2582 }
0x1454   :  { %1709 = vrot.lane.b32.xlu1 %v2583_v39, %s2641_s19 }
0x146c   :  { %v1639_v40 = vpop.f32.mrb[48].mxu1 }
0x146d   :  { %v1640_v21 = vadd.f32 %v2869_v41, %v1639_v40  ;;  %v2404_v42 = vpop.f32.mrb[49].mxu1 }
0x146e   :  { %v1642_v43 = vpop.f32.mrb[50].mxu1 }
0x146f   :  { %1645 = vst.msk [vmem:[%s3206_s9 + $0xa] sm:$0x3] %vm488_vm3, %v1640_v21  ;;  %v2405_v13 = vpop.f32.mrb[51].mxu1 }
0x1474   :  { %v1759_v44 = vpop.f32.mrb[52].mxu1 }
0x1475   :  { %v1800_v45 = vadd.f32 %v1799_v32, %v1759_v44  ;;  %v2420_v46 = vpop.f32.mrb[53].mxu1 }
0x1476   :  { %v1762_v47 = vpop.f32.mrb[54].mxu1 }
0x1477   :  { %v1805_v50 = vadd.f32 %v3151_v48, %v1800_v45  ;;  %v2421_v41 = vpop.f32.mrb[55].mxu1 }
0x1479   :  { %2584 = vtanh.f32 %v1805_v50  ;;  %v2096_v57 = vmul.f32 -1.442695, %v1805_v50 }
0x147a   :  { %2586 = vpow2.f32 %v2093_v52 }
0x1483   :  { %v2585_v51 = vpop.eup %2584 }
0x1484   :  { %1815 = vrot.lane.b32.xlu0 %v2585_v51, %s2641_s19  ;;  %v2587_v53 = vpop.eup %2586 }
0x1485   :  { %v1700_v54 = vadd.f32 1.0, %v2587_v53 }
0x1487   :  { %2588 = vrcp.f32 %v1700_v54 }
0x1488   :  { %2590 = vpow2.f32 %v2096_v57 }
0x1491   :  { %v2589_v11 = vpop.eup %2588 }
0x1492   :  { %v2591_v58 = vpop.eup %2590  ;;  %v1707_v1 = vmul.f32 %v2589_v11, %v1705_v63 }
0x1493   :  { %v1809_v59 = vadd.f32 1.0, %v2591_v58 }
0x1495   :  { %2592 = vrcp.f32 %v1809_v59 }
0x149f   :  { %v2593_v60 = vpop.eup %2592 }
0x14a0   :  { %v1813_v5 = vmul.f32 %v2593_v60, %v3095_v20  ;;  %v2613_v20 = vld [vmem:[%s3204_s7] sm:$0xff]  }
0x14c6   :  { %v1710_v55 = vpop.permute.xlu1 %1709 }
0x14c7   :  { %v1712_v56 = vmul.f32 %v2589_v11, %v1710_v55 }
0x14c9   :  { %1714 = vrot.lane.b32.xlu1 %v1712_v56, %s2646_s3 }
0x14f6   :  { %v1816_v61 = vpop.permute.xlu0 %1815 }
0x14f7   :  { %v1818_v62 = vmul.f32 %v2593_v60, %v1816_v61 }
0x14f9   :  { %1820 = vrot.lane.b32.xlu0 %v1818_v62, %s2646_s3 }
0x153b   :  { %v1715_v49 = vpop.permute.xlu1 %1714 }
0x153c   :  { %v1717_v3 = vadd.f32 %v1715_v49, %v1707_v1 }
0x153e   :  { %2594 = vtanh.f32 %v1717_v3 }
0x1548   :  { %v2595_v4 = vpop.eup %2594 }
0x1549   :  { %1720 = vrot.lane.b32.xlu1 %v2595_v4, %s2641_s19 }
0x156b   :  { %v1821_v7 = vpop.permute.xlu0 %1820 }
0x156c   :  { %v1823_v8 = vadd.f32 %v1821_v7, %v1813_v5 }
0x156e   :  { %2596 = vtanh.f32 %v1823_v8 }
0x1578   :  { %v2597_v10 = vpop.eup %2596 }
0x1579   :  { %1826 = vrot.lane.b32.xlu0 %v2597_v10, %s2641_s19 }
0x15bb   :  { %v1721_v12 = vpop.permute.xlu1 %1720 }
0x15bc   :  { %v1723_v15 = vmul.f32 %v2589_v11, %v1721_v12 }
0x15be   :  { %v1724_v25 = vpack.c.bf16 %v1723_v15, %v1723_v15 }
0x15c0   :  { %v1919_v16 = vrot.slane %v1724_v25, 3 }
0x15c2   :  { %1920 = vrot.lane.b32.xlu1 %v1919_v16, %s2646_s3 }
0x15eb   :  { %v1827_v9 = vpop.permute.xlu0 %1826 }
0x15ec   :  { %v1829_v14 = vmul.f32 %v2593_v60, %v1827_v9 }
0x15ee   :  { %v1830_v28 = vpack.c.bf16 %v1829_v14, %v1829_v14 }
0x15f0   :  { %1832 = vrot.lane.b32.xlu0 %v1830_v28, %s2646_s3 }
0x1634   :  { %v1921_v29 = vpop.permute.xlu1 %1920 }
0x1662   :  { %v1833_v23 = vpop.permute.xlu0 %1832 }
0x1663   :  { %2435 = vmatmul.mubr.msk.bf16.vlgmr.msra.gmra.mrb[56].mxu1 %vm140_vm2, %v1833_v23  ;;  %2443 = vmatmul.mubr.msk.bf16.vlgmr.msra.gmra.mrb[60].mxu0 %vm140_vm2, %v1833_v23 }
0x1664   :  { %2447 = vmatpush3.bf16.msra.mxu1 %v3105_v33  ;;  %2450 = vmatprep.mubr.msk.bf16.mxu1 %vm2644_vm0, %v2643_v0  ;;  %v2615_v33 = vld [vmem:[%s3205_s8] ss:$0 sm:$0xff] }
0x1665   :  { %2448 = vmatprep.subr.bf16.mxu1 %v2643_v0  ;;  %2455 = vmatpush3.bf16.msra.mxu0 %v2613_v20 }
0x1666   :  { %2456 = vmatprep.subr.bf16.mxu0 %v2643_v0  ;;  %2458 = vmatprep.mubr.msk.bf16.mxu0 %vm2644_vm0, %v2643_v0 }
0x1668   :  { %2449 = vmatpush3.bf16.msra.mxu1 %v3114_v17 }
0x1669   :  { %2457 = vmatpush3.bf16.msra.mxu0 %v2614_v22 }
0x166b   :  { %2451 = vmatmul.mubr.msk.bf16.vlgmr.msra.gmra.mrb[60].mxu1 %vm140_vm2, %v1921_v29 }
0x1736   :  { %v1871_v31 = vpop.f32.mrb[56].mxu1  ;;  %v1912_v27 = vpop.f32.mrb[60].mxu0 }
0x1737   :  { %v1872_v34 = vadd.f32 %v2615_v33, %v1871_v31  ;;  %v2436_v18 = vpop.f32.mrb[57].mxu1  ;;  %v2444_v24 = vpop.f32.mrb[61].mxu0 }
0x1738   :  { %v1874_v0 = vpop.f32.mrb[58].mxu1  ;;  %v1915_v36 = vpop.f32.mrb[62].mxu0 }
0x1739   :  { %1877 = vst.msk [vmem:[%s3206_s9 + $0xc] sm:$0x3] %vm488_vm3, %v1872_v34  ;;  %v2437_v17 = vpop.f32.mrb[59].mxu1  ;;  %v2445_v38 = vpop.f32.mrb[63].mxu0 }
0x173e   :  { %v1959_v30 = vpop.f32.mrb[60].mxu1 }
0x173f   :  { %v1960_v26 = vadd.f32 %v1959_v30, %v1912_v27  ;;  %v2452_v2 = vpop.f32.mrb[61].mxu1 }
0x1740   :  { %v1962_v6 = vpop.f32.mrb[62].mxu1 }
0x1741   :  { %v1965_v32 = vadd.f32 %v3151_v48, %v1960_v26  ;;  %v2453_v35 = vpop.f32.mrb[63].mxu1 }
0x1743   :  { %2598 = vtanh.f32 %v1965_v32  ;;  %v2100_v37 = vmul.f32 -1.442695, %v1965_v32 }
0x1745   :  { %2600 = vpow2.f32 %v2100_v37 }
0x174d   :  { %v2599_v19 = vpop.eup %2598 }
0x174e   :  { %1975 = vrot.lane.b32.xlu0 %v2599_v19, %s2641_s19 }
0x174f   :  { %v2601_v39 = vpop.eup %2600 }
0x1750   :  { %v1969_v40 = vadd.f32 1.0, %v2601_v39 }
0x1752   :  { %2602 = vrcp.f32 %v1969_v40 }
0x175c   :  { %v2603_v21 = vpop.eup %2602 }
0x175d   :  { %v1973_v13 = vmul.f32 %v2603_v21, %v1823_v8 }
0x17c0   :  { %v1976_v42 = vpop.permute.xlu0 %1975 }
0x17c1   :  { %v1978_v43 = vmul.f32 %v2603_v21, %v1976_v42 }
0x17c3   :  { %1980 = vrot.lane.b32.xlu1 %v1978_v43, %s2646_s3 }
0x1835   :  { %v1981_v44 = vpop.permute.xlu1 %1980 }
0x1836   :  { %v1983_v45 = vadd.f32 %v1981_v44, %v1973_v13 }
0x1838   :  { %2604 = vtanh.f32 %v1983_v45 }
0x1842   :  { %v2605_v46 = vpop.eup %2604 }
0x1843   :  { %1986 = vrot.lane.b32.xlu0 %v2605_v46, %s2641_s19 }
0x18b5   :  { %v1987_v47 = vpop.permute.xlu0 %1986 }
0x18b6   :  { %v1989_v48 = vmul.f32 %v2603_v21, %v1987_v47 }
0x18b8   :  { %v1990_v50 = vpack.c.bf16 %v1989_v48, %v1989_v48 }
0x18ba   :  { %1992 = vrot.lane.b32.xlu1 %v1990_v50, %s2646_s3 }
0x192c   :  { %v1993_v41 = vpop.permute.xlu1 %1992 }
0x192d   :  { %2459 = vmatmul.mubr.msk.bf16.vlgmr.msra.gmra.mrb[64].mxu0 %vm140_vm2, %v1993_v41 }
0x1a00   :  { %v2031_v51 = vpop.f32.mrb[64].mxu0 }
0x1a01   :  { %v2032_v52 = vadd.f32 %v2615_v33, %v2031_v51  ;;  %v2460_v53 = vpop.f32.mrb[65].mxu0 }
0x1a02   :  { %v2034_v54 = vpop.f32.mrb[66].mxu0 }
0x1a03   :  { %2037 = vst.msk [vmem:[%s3206_s9 + $0xe] sm:$0x3] %vm488_vm3, %v2032_v52  ;;  %v2461_v11 = vpop.f32.mrb[67].mxu0 }
0x1a04   :  { %2042 = vsyncpa [#allocation3], 1 }

</bundles_post_ra>
